<compile_context>
chip_gen: v7x
topology: tpu7x:2x2x1
jax: 0.10.0
libtpu: 0.0.40
codegen_flags: <defaults>
</compile_context>

<pallas_src>
import jax
import jax.numpy as jnp
from jax.experimental import pallas as pl
from jax.experimental.pallas import tpu as pltpu

# ----------------------------- small config ---------------------------------
IMG = 16          # img_shape
PATCH = 8         # patch_size
CHAN = 3          # channel
DIM = 64          # dim
N_HEAD = 4        # n_head
KV_LORA = 32      # kv_lora_rank   (q_lora_rank = 0)
QK_NOPE = 16      # qk_nope_head_dim
QK_ROPE = 8       # qk_rope_head_dim
V_HEAD = 16       # v_head_dim
INTER = 128       # inter_dim
N_LAYER = 2       # n_layer

N_PATCH = (IMG // PATCH) * (IMG // PATCH)       # 4
SEQ = N_PATCH + 1                               # 5 (cls token + patches)
SEQ_PAD = 8                                     # padded to one sublane group
PATCH_DIM = CHAN * PATCH * PATCH                # 192
QK_HEAD = QK_NOPE + QK_ROPE                     # 24
NQ_NOPE = N_HEAD * QK_NOPE                      # 64
NQ_PE = N_HEAD * QK_ROPE                        # 32
ROPE_W = NQ_PE + QK_ROPE                        # 40 (q_pe all heads + k_pe)
QKV_W = NQ_NOPE + KV_LORA + ROPE_W              # 136
EPS = 1e-6


# --------------------------- the fused ViT kernel ----------------------------
def _vit_kernel(patches_ref, pnw_ref, ppw_ref, ppb_ref, cls_ref,
                cos_ref, sin_ref, rot_ref,
                attn_nw_ref, wqkv_ref, kv_nw_ref, wkvb_ref, wo_ref,
                ffn_nw_ref, w13_ref, w2_ref, o_ref):
    f32 = jnp.float32
    bf16 = jnp.bfloat16

    def rms(t, wgt):
        var = jnp.mean(t * t, axis=-1, keepdims=True)
        return t * jax.lax.rsqrt(var + EPS) * wgt

    def bdot(a, w):  # bf16 MXU operands, f32 accumulation
        return jnp.dot(a.astype(bf16), w, preferred_element_type=f32)

    cos = cos_ref[...]                              # (SEQ_PAD, 40) f32
    sin = sin_ref[...]
    rot = rot_ref[...]                              # (40, 40) bf16, block-diag

    # padded key columns (>= SEQ) get a -1e30 additive bias; built in-kernel,
    # no dense HBM mask.
    key_ids = jax.lax.broadcasted_iota(jnp.int32, (1, 1, SEQ_PAD), 2)
    key_bias = jnp.where(key_ids < SEQ, 0.0, -1e30).astype(f32)   # (1,1,8)

    # ---- patch embedding + cls token, assembled in registers ----------------
    ptk = rms(patches_ref[0], pnw_ref[...])                       # (4, 192)
    tok = bdot(ptk, ppw_ref[...]) + ppb_ref[...]                  # (4, 64)
    cls = cls_ref[...]                                            # (1, 64)
    pad = jnp.zeros((SEQ_PAD - SEQ, DIM), f32)                    # (3, 64)
    x = jnp.concatenate([cls, tok, pad], axis=0)                  # (8, 64)

    scale = QK_HEAD ** -0.5

    for l in range(N_LAYER):
        # --------------------------- MLA attention ---------------------------
        h = rms(x, attn_nw_ref[l])
        qkv = bdot(h, wqkv_ref[l])                                # (8, 136)
        q_nope = qkv[:, :NQ_NOPE]                                 # (8, 64)
        kv_c = rms(qkv[:, NQ_NOPE:NQ_NOPE + KV_LORA], kv_nw_ref[l])  # (8, 32)

        # RoPE applied once to the contiguous [q_pe all heads | k_pe] slab
        pe = qkv[:, NQ_NOPE + KV_LORA:]                           # (8, 40)
        pe = pe * cos + bdot(pe, rot) * sin
        q_pe = pe[:, :NQ_PE]                                      # (8, 32)
        k_pe = pe[:, NQ_PE:]                                      # (8, 8), shared

        kv_b = bdot(kv_c, wkvb_ref[l])                            # (8, 128)
        k_nope = kv_b[:, :N_HEAD * QK_NOPE]                       # (8, 64)
        v_all = kv_b[:, N_HEAD * QK_NOPE:]                        # (8, 64)

        # head-batched q / k / v : (H, S, d)
        q_h = jnp.stack(
            [jnp.concatenate([q_nope[:, hh * QK_NOPE:(hh + 1) * QK_NOPE],
                              q_pe[:, hh * QK_ROPE:(hh + 1) * QK_ROPE]],
                             axis=-1)
             for hh in range(N_HEAD)], axis=0)                    # (4, 8, 24)
        k_h = jnp.stack(
            [jnp.concatenate([k_nope[:, hh * QK_NOPE:(hh + 1) * QK_NOPE],
                              k_pe], axis=-1)
             for hh in range(N_HEAD)], axis=0)                    # (4, 8, 24)
        v_h = jnp.stack(
            [v_all[:, hh * V_HEAD:(hh + 1) * V_HEAD]
             for hh in range(N_HEAD)], axis=0)                    # (4, 8, 16)

        # single batched score matmul + single softmax over all heads
        s = jnp.einsum('hqd,hkd->hqk', q_h.astype(bf16), k_h.astype(bf16),
                       preferred_element_type=f32) * scale + key_bias
        s = s - jnp.max(s, axis=-1, keepdims=True)
        p = jnp.exp(s)
        denom = jnp.sum(p, axis=-1, keepdims=True)
        o_h = jnp.einsum('hqk,hkd->hqd', p.astype(bf16), v_h.astype(bf16),
                         preferred_element_type=f32)              # (4, 8, 16)
        o_h = o_h * pl.reciprocal(denom, approx=True)

        # concatenate heads and do ONE (8,64)@(64,64) output projection
        o_cat = jnp.concatenate([o_h[hh] for hh in range(N_HEAD)], axis=-1)
        x = x + bdot(o_cat, wo_ref[l])

        # --------------------------- SwiGLU MLP ------------------------------
        h = rms(x, ffn_nw_ref[l])
        g = bdot(h, w13_ref[l])                                   # (8, 256)
        g1 = g[:, :INTER]
        g3 = g[:, INTER:]
        x = x + bdot(g1 * jax.nn.sigmoid(g1) * g3, w2_ref[l])

    # Extract('img') fused: write only the patch rows (drop cls + padding).
    o_ref[0] = x[1:1 + N_PATCH, :]


# -------------------------------- wrapper ------------------------------------
def vit_forward(x_nchw, params):
    b, c, hh, ww = x_nchw.shape
    h, w = hh // PATCH, ww // PATCH
    # Rearrange 'b c (h p_h) (w p_w) -> b (h w) (c p_h p_w)'  (layout glue)
    patches = (x_nchw.reshape(b, c, h, PATCH, w, PATCH)
               .transpose(0, 2, 4, 1, 3, 5)
               .reshape(b, h * w, c * PATCH * PATCH))

    def shared2(arr):
        return pl.BlockSpec(arr.shape, lambda i: (0, 0))

    def shared3(arr):
        return pl.BlockSpec(arr.shape, lambda i: (0, 0, 0))

    out = pl.pallas_call(
        _vit_kernel,
        out_shape=jax.ShapeDtypeStruct((b, N_PATCH, DIM), jnp.float32),
        grid=(b,),
        in_specs=[
            pl.BlockSpec((1, N_PATCH, PATCH_DIM), lambda i: (i, 0, 0)),
            shared2(params["patch_norm_w"]),
            shared2(params["patch_proj_w"]),
            shared2(params["patch_proj_b"]),
            shared2(params["cls_token"]),
            shared2(params["rope_cos"]),
            shared2(params["rope_sin"]),
            shared2(params["rope_rot"]),
            shared3(params["attn_norm_w"]),
            shared3(params["wqkv"]),
            shared3(params["kv_norm_w"]),
            shared3(params["wkv_b"]),
            shared3(params["wo"]),
            shared3(params["ffn_norm_w"]),
            shared3(params["w13"]),
            shared3(params["w2"]),
        ],
        out_specs=pl.BlockSpec((1, N_PATCH, DIM), lambda i: (i, 0, 0)),
        compiler_params=pltpu.CompilerParams(
            dimension_semantics=("parallel",),
            vmem_limit_bytes=16 * 1024 * 1024),
    )(patches,
      params["patch_norm_w"], params["patch_proj_w"], params["patch_proj_b"],
      params["cls_token"], params["rope_cos"], params["rope_sin"],
      params["rope_rot"], params["attn_norm_w"], params["wqkv"],
      params["kv_norm_w"], params["wkv_b"], params["wo"],
      params["ffn_norm_w"], params["w13"], params["w2"])

    # to_out = Extract('img') (num_classes is None): patch tokens only.
    # TODO(synk): Extract('img') semantics assumed to return the patch tokens.
    return out


# ------------------------------ parameter init --------------------------------
def init_params(key):
    keys = iter(jax.random.split(key, 64))
    bf16 = jnp.bfloat16

    def w(shape, scale=0.02, dtype=bf16):
        return (scale * jax.random.normal(next(keys), shape)).astype(dtype)

    params = {
        "patch_norm_w": jnp.ones((1, PATCH_DIM), jnp.float32),
        "patch_proj_w": w((PATCH_DIM, DIM)),
        "patch_proj_b": jnp.zeros((1, DIM), jnp.float32),
        "cls_token": w((1, DIM), scale=1.0, dtype=jnp.float32),
    }

    # RoPE tables, interleaved (re, im) convention, pre-tiled over the
    # [q_pe(4 heads) | k_pe] 40-wide slab, for SEQ_PAD positions.
    # TODO(synk): precompute_rope_emb convention assumed to be interleaved.
    freqs = 1.0 / (10000.0 ** (jnp.arange(0, QK_ROPE, 2, dtype=jnp.float32)
                               / QK_ROPE))
    t = jnp.arange(SEQ_PAD, dtype=jnp.float32)
    ang = jnp.outer(t, freqs)                                   # (8, 4)
    cos8 = jnp.repeat(jnp.cos(ang), 2, axis=1)                  # (8, 8)
    sin8 = jnp.repeat(jnp.sin(ang), 2, axis=1)
    params["rope_cos"] = jnp.tile(cos8, (1, N_HEAD + 1))        # (8, 40)
    params["rope_sin"] = jnp.tile(sin8, (1, N_HEAD + 1))
    idx = jnp.arange(QK_ROPE)
    rot8 = jnp.zeros((QK_ROPE, QK_ROPE), jnp.float32)
    rot8 = rot8.at[idx[1::2], idx[0::2]].set(-1.0)              # P[2i+1,2i] = -1
    rot8 = rot8.at[idx[0::2], idx[1::2]].set(1.0)               # P[2i,2i+1] = +1
    params["rope_rot"] = jnp.kron(jnp.eye(N_HEAD + 1, dtype=jnp.float32),
                                  rot8).astype(bf16)            # (40, 40)

    attn_nw, wqkv, kv_nw, wkvb, wo_, ffn_nw, w13, w2_ = ([] for _ in range(8))
    for _ in range(N_LAYER):
        attn_nw.append(jnp.ones((1, DIM), jnp.float32))
        # fused wq|wkv_a with layout [q_nope all heads | kv_c | q_pe all | k_pe]
        w_qnope = w((DIM, NQ_NOPE))
        w_kv_a = w((DIM, KV_LORA))
        w_qpe = w((DIM, NQ_PE))
        w_kpe = w((DIM, QK_ROPE))
        wqkv.append(jnp.concatenate([w_qnope, w_kv_a, w_qpe, w_kpe], axis=1))
        kv_nw.append(jnp.ones((1, KV_LORA), jnp.float32))
        # wkv_b with layout [k_nope all heads | v all heads]
        w_knope = w((KV_LORA, N_HEAD * QK_NOPE))
        w_v = w((KV_LORA, N_HEAD * V_HEAD))
        wkvb.append(jnp.concatenate([w_knope, w_v], axis=1))    # (32, 128)
        wo_.append(w((N_HEAD * V_HEAD, DIM)))                   # (64, 64)
        ffn_nw.append(jnp.ones((1, DIM), jnp.float32))
        w1 = w((DIM, INTER))
        w3 = w((DIM, INTER))
        w13.append(jnp.concatenate([w1, w3], axis=1))           # (64, 256)
        w2_.append(w((INTER, DIM)))

    params["attn_norm_w"] = jnp.stack(attn_nw)                  # (L, 1, 64)
    params["wqkv"] = jnp.stack(wqkv)                            # (L, 64, 136)
    params["kv_norm_w"] = jnp.stack(kv_nw)                      # (L, 1, 32)
    params["wkv_b"] = jnp.stack(wkvb)                           # (L, 32, 128)
    params["wo"] = jnp.stack(wo_)                               # (L, 64, 64)
    params["ffn_norm_w"] = jnp.stack(ffn_nw)                    # (L, 1, 64)
    params["w13"] = jnp.stack(w13)                              # (L, 64, 256)
    params["w2"] = jnp.stack(w2_)                               # (L, 128, 64)
    return params


# ----------------------------------- main -------------------------------------
if __name__ == "__main__":
    key = jax.random.PRNGKey(0)
    k_param, k_input = jax.random.split(key)
    params = init_params(k_param)
    x = jax.random.normal(k_input, (2, CHAN, IMG, IMG), dtype=jnp.float32)

    fwd = jax.jit(vit_forward)
    out = fwd(x, params)
    jax.block_until_ready(out)
    assert out.shape == (2, N_PATCH, DIM), out.shape
    assert jnp.all(jnp.isfinite(out))
    print("KERNEL_OK")
</pallas_src>

<mosaic_0001>
module attributes {stable_mosaic.version = 11 : i64} {
  func.func @_vit_kernel(%arg0: i32, %arg1: memref<1x4x192xf32, #tpu.memory_space<vmem>>, %arg2: memref<1x192xf32, #tpu.memory_space<vmem>>, %arg3: memref<192x64xbf16, #tpu.memory_space<vmem>>, %arg4: memref<1x64xf32, #tpu.memory_space<vmem>>, %arg5: memref<1x64xf32, #tpu.memory_space<vmem>>, %arg6: memref<8x40xf32, #tpu.memory_space<vmem>>, %arg7: memref<8x40xf32, #tpu.memory_space<vmem>>, %arg8: memref<40x40xbf16, #tpu.memory_space<vmem>>, %arg9: memref<2x1x64xf32, #tpu.memory_space<vmem>>, %arg10: memref<2x64x136xbf16, #tpu.memory_space<vmem>>, %arg11: memref<2x1x32xf32, #tpu.memory_space<vmem>>, %arg12: memref<2x32x128xbf16, #tpu.memory_space<vmem>>, %arg13: memref<2x64x64xbf16, #tpu.memory_space<vmem>>, %arg14: memref<2x1x64xf32, #tpu.memory_space<vmem>>, %arg15: memref<2x64x256xbf16, #tpu.memory_space<vmem>>, %arg16: memref<2x128x64xbf16, #tpu.memory_space<vmem>>, %arg17: memref<1x4x64xf32, #tpu.memory_space<vmem>>) attributes {dimension_semantics = [#tpu.dimension_semantics<parallel>], iteration_bounds = array<i64: 2>, scalar_prefetch = 0 : i64, scratch_operands = 0 : i64, tpu.core_type = #tpu.core_type<tc>, window_params = [{transform_indices = @transform_0, window_bounds = array<i64: 1, 4, 192>}, {pipeline_mode = #tpu.pipeline_mode<synchronous>, transform_indices = @transform_1, window_bounds = array<i64: 1, 192>}, {pipeline_mode = #tpu.pipeline_mode<synchronous>, transform_indices = @transform_2, window_bounds = array<i64: 192, 64>}, {pipeline_mode = #tpu.pipeline_mode<synchronous>, transform_indices = @transform_3, window_bounds = array<i64: 1, 64>}, {pipeline_mode = #tpu.pipeline_mode<synchronous>, transform_indices = @transform_4, window_bounds = array<i64: 1, 64>}, {pipeline_mode = #tpu.pipeline_mode<synchronous>, transform_indices = @transform_5, window_bounds = array<i64: 8, 40>}, {pipeline_mode = #tpu.pipeline_mode<synchronous>, transform_indices = @transform_6, window_bounds = array<i64: 8, 40>}, {pipeline_mode = #tpu.pipeline_mode<synchronous>, transform_indices = @transform_7, window_bounds = array<i64: 40, 40>}, {pipeline_mode = #tpu.pipeline_mode<synchronous>, transform_indices = @transform_8, window_bounds = array<i64: 2, 1, 64>}, {pipeline_mode = #tpu.pipeline_mode<synchronous>, transform_indices = @transform_9, window_bounds = array<i64: 2, 64, 136>}, {pipeline_mode = #tpu.pipeline_mode<synchronous>, transform_indices = @transform_10, window_bounds = array<i64: 2, 1, 32>}, {pipeline_mode = #tpu.pipeline_mode<synchronous>, transform_indices = @transform_11, window_bounds = array<i64: 2, 32, 128>}, {pipeline_mode = #tpu.pipeline_mode<synchronous>, transform_indices = @transform_12, window_bounds = array<i64: 2, 64, 64>}, {pipeline_mode = #tpu.pipeline_mode<synchronous>, transform_indices = @transform_13, window_bounds = array<i64: 2, 1, 64>}, {pipeline_mode = #tpu.pipeline_mode<synchronous>, transform_indices = @transform_14, window_bounds = array<i64: 2, 64, 256>}, {pipeline_mode = #tpu.pipeline_mode<synchronous>, transform_indices = @transform_15, window_bounds = array<i64: 2, 128, 64>}, {transform_indices = @transform_16, window_bounds = array<i64: 1, 4, 64>}]} {
    %c0 = arith.constant 0 : index
    %c0_0 = arith.constant 0 : index
    %0 = vector.load %arg6[%c0, %c0_0] : memref<8x40xf32, #tpu.memory_space<vmem>>, vector<8x40xf32>
    %c0_1 = arith.constant 0 : index
    %c0_2 = arith.constant 0 : index
    %1 = vector.load %arg7[%c0_1, %c0_2] : memref<8x40xf32, #tpu.memory_space<vmem>>, vector<8x40xf32>
    %c0_3 = arith.constant 0 : index
    %c0_4 = arith.constant 0 : index
    %2 = vector.load %arg8[%c0_3, %c0_4] : memref<40x40xbf16, #tpu.memory_space<vmem>>, vector<40x40xbf16>
    %3 = tpu.iota {dimensions = array<i32: 2>} : vector<1x1x8xi32>
    %c5_i32 = arith.constant 5 : i32
    %4 = vector.broadcast %c5_i32 : i32 to vector<1x1x8xi32>
    %5 = arith.cmpi slt, %3, %4 : vector<1x1x8xi32>
    %cst = arith.constant 0.000000e+00 : f32
    %cst_5 = arith.constant -1.000000e+30 : f32
    %6 = vector.broadcast %cst : f32 to vector<1x1x8xf32>
    %7 = vector.broadcast %cst_5 : f32 to vector<1x1x8xf32>
    %8 = arith.select %5, %6, %7 : vector<1x1x8xi1>, vector<1x1x8xf32>
    %c0_6 = arith.constant 0 : index
    %c0_7 = arith.constant 0 : index
    %c0_8 = arith.constant 0 : index
    %9 = vector.load %arg1[%c0_6, %c0_7, %c0_8] : memref<1x4x192xf32, #tpu.memory_space<vmem>>, vector<1x4x192xf32>
    %10 = vector.shape_cast %9 : vector<1x4x192xf32> to vector<4x192xf32>
    %c0_9 = arith.constant 0 : index
    %c0_10 = arith.constant 0 : index
    %11 = vector.load %arg2[%c0_9, %c0_10] : memref<1x192xf32, #tpu.memory_space<vmem>>, vector<1x192xf32>
    %12 = arith.mulf %10, %10 : vector<4x192xf32>
    %cst_11 = arith.constant dense<0.000000e+00> : vector<4xf32>
    %13 = vector.multi_reduction <add>, %12, %cst_11 [1] : vector<4x192xf32> to vector<4xf32>
    %14 = vector.shape_cast %13 : vector<4xf32> to vector<4x1xf32>
    %cst_12 = arith.constant 1.920000e+02 : f32
    %15 = vector.broadcast %cst_12 : f32 to vector<4x1xf32>
    %16 = arith.divf %14, %15 : vector<4x1xf32>
    %cst_13 = arith.constant 9.99999997E-7 : f32
    %17 = vector.broadcast %cst_13 : f32 to vector<4x1xf32>
    %18 = arith.addf %16, %17 : vector<4x1xf32>
    %19 = math.rsqrt %18 : vector<4x1xf32>
    %20 = vector.broadcast %19 : vector<4x1xf32> to vector<4x192xf32>
    %21 = arith.mulf %10, %20 : vector<4x192xf32>
    %22 = vector.broadcast %11 : vector<1x192xf32> to vector<4x192xf32>
    %23 = arith.mulf %21, %22 : vector<4x192xf32>
    %c0_14 = arith.constant 0 : index
    %c0_15 = arith.constant 0 : index
    %24 = vector.load %arg3[%c0_14, %c0_15] : memref<192x64xbf16, #tpu.memory_space<vmem>>, vector<192x64xbf16>
    %25 = arith.truncf %23 : vector<4x192xf32> to vector<4x192xbf16>
    %cst_16 = arith.constant dense<0.000000e+00> : vector<4x64xf32>
    %26 = tpu.matmul %25, %24, %cst_16 {dimension_numbers = #tpu.dot_dimension_numbers<[1], [0], [0], [1], [0, 0, 1, 1], [], []>} : vector<4x192xbf16>, vector<192x64xbf16>, vector<4x64xf32> -> vector<4x64xf32>
    %c0_17 = arith.constant 0 : index
    %c0_18 = arith.constant 0 : index
    %27 = vector.load %arg4[%c0_17, %c0_18] : memref<1x64xf32, #tpu.memory_space<vmem>>, vector<1x64xf32>
    %28 = vector.broadcast %27 : vector<1x64xf32> to vector<4x64xf32>
    %29 = arith.addf %26, %28 : vector<4x64xf32>
    %c0_19 = arith.constant 0 : index
    %c0_20 = arith.constant 0 : index
    %30 = vector.load %arg5[%c0_19, %c0_20] : memref<1x64xf32, #tpu.memory_space<vmem>>, vector<1x64xf32>
    %cst_21 = arith.constant 0.000000e+00 : f32
    %31 = vector.broadcast %cst_21 : f32 to vector<3x64xf32>
    %32 = tpu.concatenate %30, %29, %31 in 0 : vector<1x64xf32>, vector<4x64xf32>, vector<3x64xf32> -> vector<8x64xf32>
    %c0_22 = arith.constant 0 : index
    %c0_23 = arith.constant 0 : index
    %c0_24 = arith.constant 0 : index
    %33 = vector.load %arg9[%c0_22, %c0_23, %c0_24] : memref<2x1x64xf32, #tpu.memory_space<vmem>>, vector<1x1x64xf32>
    %34 = vector.shape_cast %33 : vector<1x1x64xf32> to vector<1x64xf32>
    %35 = arith.mulf %32, %32 : vector<8x64xf32>
    %cst_25 = arith.constant dense<0.000000e+00> : vector<8xf32>
    %36 = vector.multi_reduction <add>, %35, %cst_25 [1] : vector<8x64xf32> to vector<8xf32>
    %37 = vector.shape_cast %36 : vector<8xf32> to vector<8x1xf32>
    %cst_26 = arith.constant 6.400000e+01 : f32
    %38 = vector.broadcast %cst_26 : f32 to vector<8x1xf32>
    %39 = arith.divf %37, %38 : vector<8x1xf32>
    %cst_27 = arith.constant 9.99999997E-7 : f32
    %40 = vector.broadcast %cst_27 : f32 to vector<8x1xf32>
    %41 = arith.addf %39, %40 : vector<8x1xf32>
    %42 = math.rsqrt %41 : vector<8x1xf32>
    %43 = vector.broadcast %42 : vector<8x1xf32> to vector<8x64xf32>
    %44 = arith.mulf %32, %43 : vector<8x64xf32>
    %45 = vector.broadcast %34 : vector<1x64xf32> to vector<8x64xf32>
    %46 = arith.mulf %44, %45 : vector<8x64xf32>
    %c0_28 = arith.constant 0 : index
    %c0_29 = arith.constant 0 : index
    %c0_30 = arith.constant 0 : index
    %47 = vector.load %arg10[%c0_28, %c0_29, %c0_30] : memref<2x64x136xbf16, #tpu.memory_space<vmem>>, vector<1x64x136xbf16>
    %48 = vector.shape_cast %47 : vector<1x64x136xbf16> to vector<64x136xbf16>
    %49 = arith.truncf %46 : vector<8x64xf32> to vector<8x64xbf16>
    %cst_31 = arith.constant dense<0.000000e+00> : vector<8x136xf32>
    %50 = tpu.matmul %49, %48, %cst_31 {dimension_numbers = #tpu.dot_dimension_numbers<[1], [0], [0], [1], [0, 0, 1, 1], [], []>} : vector<8x64xbf16>, vector<64x136xbf16>, vector<8x136xf32> -> vector<8x136xf32>
    %51 = vector.extract_strided_slice %50 {offsets = [0, 0], sizes = [8, 64], strides = [1, 1]} : vector<8x136xf32> to vector<8x64xf32>
    %52 = vector.extract_strided_slice %50 {offsets = [0, 64], sizes = [8, 32], strides = [1, 1]} : vector<8x136xf32> to vector<8x32xf32>
    %c0_32 = arith.constant 0 : index
    %c0_33 = arith.constant 0 : index
    %c0_34 = arith.constant 0 : index
    %53 = vector.load %arg11[%c0_32, %c0_33, %c0_34] : memref<2x1x32xf32, #tpu.memory_space<vmem>>, vector<1x1x32xf32>
    %54 = vector.shape_cast %53 : vector<1x1x32xf32> to vector<1x32xf32>
    %55 = arith.mulf %52, %52 : vector<8x32xf32>
    %cst_35 = arith.constant dense<0.000000e+00> : vector<8xf32>
    %56 = vector.multi_reduction <add>, %55, %cst_35 [1] : vector<8x32xf32> to vector<8xf32>
    %57 = vector.shape_cast %56 : vector<8xf32> to vector<8x1xf32>
    %cst_36 = arith.constant 3.200000e+01 : f32
    %58 = vector.broadcast %cst_36 : f32 to vector<8x1xf32>
    %59 = arith.divf %57, %58 : vector<8x1xf32>
    %cst_37 = arith.constant 9.99999997E-7 : f32
    %60 = vector.broadcast %cst_37 : f32 to vector<8x1xf32>
    %61 = arith.addf %59, %60 : vector<8x1xf32>
    %62 = math.rsqrt %61 : vector<8x1xf32>
    %63 = vector.broadcast %62 : vector<8x1xf32> to vector<8x32xf32>
    %64 = arith.mulf %52, %63 : vector<8x32xf32>
    %65 = vector.broadcast %54 : vector<1x32xf32> to vector<8x32xf32>
    %66 = arith.mulf %64, %65 : vector<8x32xf32>
    %67 = vector.extract_strided_slice %50 {offsets = [0, 96], sizes = [8, 40], strides = [1, 1]} : vector<8x136xf32> to vector<8x40xf32>
    %68 = arith.mulf %67, %0 : vector<8x40xf32>
    %69 = arith.truncf %67 : vector<8x40xf32> to vector<8x40xbf16>
    %cst_38 = arith.constant dense<0.000000e+00> : vector<8x40xf32>
    %70 = tpu.matmul %69, %2, %cst_38 {dimension_numbers = #tpu.dot_dimension_numbers<[1], [0], [0], [1], [0, 0, 1, 1], [], []>} : vector<8x40xbf16>, vector<40x40xbf16>, vector<8x40xf32> -> vector<8x40xf32>
    %71 = arith.mulf %70, %1 : vector<8x40xf32>
    %72 = arith.addf %68, %71 : vector<8x40xf32>
    %73 = vector.extract_strided_slice %72 {offsets = [0, 0], sizes = [8, 32], strides = [1, 1]} : vector<8x40xf32> to vector<8x32xf32>
    %74 = vector.extract_strided_slice %72 {offsets = [0, 32], sizes = [8, 8], strides = [1, 1]} : vector<8x40xf32> to vector<8x8xf32>
    %c0_39 = arith.constant 0 : index
    %c0_40 = arith.constant 0 : index
    %c0_41 = arith.constant 0 : index
    %75 = vector.load %arg12[%c0_39, %c0_40, %c0_41] : memref<2x32x128xbf16, #tpu.memory_space<vmem>>, vector<1x32x128xbf16>
    %76 = vector.shape_cast %75 : vector<1x32x128xbf16> to vector<32x128xbf16>
    %77 = arith.truncf %66 : vector<8x32xf32> to vector<8x32xbf16>
    %cst_42 = arith.constant dense<0.000000e+00> : vector<8x128xf32>
    %78 = tpu.matmul %77, %76, %cst_42 {dimension_numbers = #tpu.dot_dimension_numbers<[1], [0], [0], [1], [0, 0, 1, 1], [], []>} : vector<8x32xbf16>, vector<32x128xbf16>, vector<8x128xf32> -> vector<8x128xf32>
    %79 = vector.extract_strided_slice %78 {offsets = [0, 0], sizes = [8, 64], strides = [1, 1]} : vector<8x128xf32> to vector<8x64xf32>
    %80 = vector.extract_strided_slice %78 {offsets = [0, 64], sizes = [8, 64], strides = [1, 1]} : vector<8x128xf32> to vector<8x64xf32>
    %81 = vector.extract_strided_slice %51 {offsets = [0, 0], sizes = [8, 16], strides = [1, 1]} : vector<8x64xf32> to vector<8x16xf32>
    %82 = vector.extract_strided_slice %73 {offsets = [0, 0], sizes = [8, 8], strides = [1, 1]} : vector<8x32xf32> to vector<8x8xf32>
    %83 = tpu.concatenate %81, %82 in 1 : vector<8x16xf32>, vector<8x8xf32> -> vector<8x24xf32>
    %84 = vector.extract_strided_slice %51 {offsets = [0, 16], sizes = [8, 16], strides = [1, 1]} : vector<8x64xf32> to vector<8x16xf32>
    %85 = vector.extract_strided_slice %73 {offsets = [0, 8], sizes = [8, 8], strides = [1, 1]} : vector<8x32xf32> to vector<8x8xf32>
    %86 = tpu.concatenate %84, %85 in 1 : vector<8x16xf32>, vector<8x8xf32> -> vector<8x24xf32>
    %87 = vector.extract_strided_slice %51 {offsets = [0, 32], sizes = [8, 16], strides = [1, 1]} : vector<8x64xf32> to vector<8x16xf32>
    %88 = vector.extract_strided_slice %73 {offsets = [0, 16], sizes = [8, 8], strides = [1, 1]} : vector<8x32xf32> to vector<8x8xf32>
    %89 = tpu.concatenate %87, %88 in 1 : vector<8x16xf32>, vector<8x8xf32> -> vector<8x24xf32>
    %90 = vector.extract_strided_slice %51 {offsets = [0, 48], sizes = [8, 16], strides = [1, 1]} : vector<8x64xf32> to vector<8x16xf32>
    %91 = vector.extract_strided_slice %73 {offsets = [0, 24], sizes = [8, 8], strides = [1, 1]} : vector<8x32xf32> to vector<8x8xf32>
    %92 = tpu.concatenate %90, %91 in 1 : vector<8x16xf32>, vector<8x8xf32> -> vector<8x24xf32>
    %93 = vector.shape_cast %83 : vector<8x24xf32> to vector<1x8x24xf32>
    %94 = vector.shape_cast %86 : vector<8x24xf32> to vector<1x8x24xf32>
    %95 = vector.shape_cast %89 : vector<8x24xf32> to vector<1x8x24xf32>
    %96 = vector.shape_cast %92 : vector<8x24xf32> to vector<1x8x24xf32>
    %97 = tpu.concatenate %93, %94, %95, %96 in 0 : vector<1x8x24xf32>, vector<1x8x24xf32>, vector<1x8x24xf32>, vector<1x8x24xf32> -> vector<4x8x24xf32>
    %98 = vector.extract_strided_slice %79 {offsets = [0, 0], sizes = [8, 16], strides = [1, 1]} : vector<8x64xf32> to vector<8x16xf32>
    %99 = tpu.concatenate %98, %74 in 1 : vector<8x16xf32>, vector<8x8xf32> -> vector<8x24xf32>
    %100 = vector.extract_strided_slice %79 {offsets = [0, 16], sizes = [8, 16], strides = [1, 1]} : vector<8x64xf32> to vector<8x16xf32>
    %101 = tpu.concatenate %100, %74 in 1 : vector<8x16xf32>, vector<8x8xf32> -> vector<8x24xf32>
    %102 = vector.extract_strided_slice %79 {offsets = [0, 32], sizes = [8, 16], strides = [1, 1]} : vector<8x64xf32> to vector<8x16xf32>
    %103 = tpu.concatenate %102, %74 in 1 : vector<8x16xf32>, vector<8x8xf32> -> vector<8x24xf32>
    %104 = vector.extract_strided_slice %79 {offsets = [0, 48], sizes = [8, 16], strides = [1, 1]} : vector<8x64xf32> to vector<8x16xf32>
    %105 = tpu.concatenate %104, %74 in 1 : vector<8x16xf32>, vector<8x8xf32> -> vector<8x24xf32>
    %106 = vector.shape_cast %99 : vector<8x24xf32> to vector<1x8x24xf32>
    %107 = vector.shape_cast %101 : vector<8x24xf32> to vector<1x8x24xf32>
    %108 = vector.shape_cast %103 : vector<8x24xf32> to vector<1x8x24xf32>
    %109 = vector.shape_cast %105 : vector<8x24xf32> to vector<1x8x24xf32>
    %110 = tpu.concatenate %106, %107, %108, %109 in 0 : vector<1x8x24xf32>, vector<1x8x24xf32>, vector<1x8x24xf32>, vector<1x8x24xf32> -> vector<4x8x24xf32>
    %111 = vector.extract_strided_slice %80 {offsets = [0, 0], sizes = [8, 16], strides = [1, 1]} : vector<8x64xf32> to vector<8x16xf32>
    %112 = vector.extract_strided_slice %80 {offsets = [0, 16], sizes = [8, 16], strides = [1, 1]} : vector<8x64xf32> to vector<8x16xf32>
    %113 = vector.extract_strided_slice %80 {offsets = [0, 32], sizes = [8, 16], strides = [1, 1]} : vector<8x64xf32> to vector<8x16xf32>
    %114 = vector.extract_strided_slice %80 {offsets = [0, 48], sizes = [8, 16], strides = [1, 1]} : vector<8x64xf32> to vector<8x16xf32>
    %115 = vector.shape_cast %111 : vector<8x16xf32> to vector<1x8x16xf32>
    %116 = vector.shape_cast %112 : vector<8x16xf32> to vector<1x8x16xf32>
    %117 = vector.shape_cast %113 : vector<8x16xf32> to vector<1x8x16xf32>
    %118 = vector.shape_cast %114 : vector<8x16xf32> to vector<1x8x16xf32>
    %119 = tpu.concatenate %115, %116, %117, %118 in 0 : vector<1x8x16xf32>, vector<1x8x16xf32>, vector<1x8x16xf32>, vector<1x8x16xf32> -> vector<4x8x16xf32>
    %120 = arith.truncf %97 : vector<4x8x24xf32> to vector<4x8x24xbf16>
    %121 = arith.truncf %110 : vector<4x8x24xf32> to vector<4x8x24xbf16>
    "tpu.trace_start"() <{level = 10 : i32, message = "hqd,hkd->hqk"}> : () -> ()
    %cst_43 = arith.constant dense<0.000000e+00> : vector<4x8x8xf32>
    %122 = tpu.matmul %120, %121, %cst_43 {dimension_numbers = #tpu.dot_dimension_numbers<[2], [2], [1], [1], [0, 0, 0, 1, 1, 1], [0], [0]>} : vector<4x8x24xbf16>, vector<4x8x24xbf16>, vector<4x8x8xf32> -> vector<4x8x8xf32>
    "tpu.trace_stop"() : () -> ()
    %cst_44 = arith.constant 0.204124153 : f32
    %123 = vector.broadcast %cst_44 : f32 to vector<4x8x8xf32>
    %124 = arith.mulf %122, %123 : vector<4x8x8xf32>
    %125 = vector.broadcast %8 : vector<1x1x8xf32> to vector<4x8x8xf32>
    %126 = arith.addf %124, %125 : vector<4x8x8xf32>
    %cst_45 = arith.constant dense<0xFF800000> : vector<4x8xf32>
    %127 = vector.multi_reduction <maximumf>, %126, %cst_45 [2] : vector<4x8x8xf32> to vector<4x8xf32>
    %128 = vector.shape_cast %127 : vector<4x8xf32> to vector<4x8x1xf32>
    %129 = vector.broadcast %128 : vector<4x8x1xf32> to vector<4x8x8xf32>
    %130 = arith.subf %126, %129 : vector<4x8x8xf32>
    %131 = math.exp %130 : vector<4x8x8xf32>
    %cst_46 = arith.constant dense<0.000000e+00> : vector<4x8xf32>
    %132 = vector.multi_reduction <add>, %131, %cst_46 [2] : vector<4x8x8xf32> to vector<4x8xf32>
    %133 = vector.shape_cast %132 : vector<4x8xf32> to vector<4x8x1xf32>
    %134 = arith.truncf %131 : vector<4x8x8xf32> to vector<4x8x8xbf16>
    %135 = arith.truncf %119 : vector<4x8x16xf32> to vector<4x8x16xbf16>
    "tpu.trace_start"() <{level = 10 : i32, message = "hqk,hkd->hqd"}> : () -> ()
    %cst_47 = arith.constant dense<0.000000e+00> : vector<4x8x16xf32>
    %136 = tpu.matmul %134, %135, %cst_47 {dimension_numbers = #tpu.dot_dimension_numbers<[2], [1], [1], [2], [0, 0, 0, 1, 1, 2], [0], [0]>} : vector<4x8x8xbf16>, vector<4x8x16xbf16>, vector<4x8x16xf32> -> vector<4x8x16xf32>
    "tpu.trace_stop"() : () -> ()
    %137 = tpu.reciprocal %133 {approx = true} : vector<4x8x1xf32> -> vector<4x8x1xf32>
    %138 = vector.broadcast %137 : vector<4x8x1xf32> to vector<4x8x16xf32>
    %139 = arith.mulf %136, %138 : vector<4x8x16xf32>
    %140 = vector.extract_strided_slice %139 {offsets = [0, 0, 0], sizes = [1, 8, 16], strides = [1, 1, 1]} : vector<4x8x16xf32> to vector<1x8x16xf32>
    %141 = vector.shape_cast %140 : vector<1x8x16xf32> to vector<8x16xf32>
    %142 = vector.extract_strided_slice %139 {offsets = [1, 0, 0], sizes = [1, 8, 16], strides = [1, 1, 1]} : vector<4x8x16xf32> to vector<1x8x16xf32>
    %143 = vector.shape_cast %142 : vector<1x8x16xf32> to vector<8x16xf32>
    %144 = vector.extract_strided_slice %139 {offsets = [2, 0, 0], sizes = [1, 8, 16], strides = [1, 1, 1]} : vector<4x8x16xf32> to vector<1x8x16xf32>
    %145 = vector.shape_cast %144 : vector<1x8x16xf32> to vector<8x16xf32>
    %146 = vector.extract_strided_slice %139 {offsets = [3, 0, 0], sizes = [1, 8, 16], strides = [1, 1, 1]} : vector<4x8x16xf32> to vector<1x8x16xf32>
    %147 = vector.shape_cast %146 : vector<1x8x16xf32> to vector<8x16xf32>
    %148 = tpu.concatenate %141, %143, %145, %147 in 1 : vector<8x16xf32>, vector<8x16xf32>, vector<8x16xf32>, vector<8x16xf32> -> vector<8x64xf32>
    %c0_48 = arith.constant 0 : index
    %c0_49 = arith.constant 0 : index
    %c0_50 = arith.constant 0 : index
    %149 = vector.load %arg13[%c0_48, %c0_49, %c0_50] : memref<2x64x64xbf16, #tpu.memory_space<vmem>>, vector<1x64x64xbf16>
    %150 = vector.shape_cast %149 : vector<1x64x64xbf16> to vector<64x64xbf16>
    %151 = arith.truncf %148 : vector<8x64xf32> to vector<8x64xbf16>
    %cst_51 = arith.constant dense<0.000000e+00> : vector<8x64xf32>
    %152 = tpu.matmul %151, %150, %cst_51 {dimension_numbers = #tpu.dot_dimension_numbers<[1], [0], [0], [1], [0, 0, 1, 1], [], []>} : vector<8x64xbf16>, vector<64x64xbf16>, vector<8x64xf32> -> vector<8x64xf32>
    %153 = arith.addf %32, %152 : vector<8x64xf32>
    %c0_52 = arith.constant 0 : index
    %c0_53 = arith.constant 0 : index
    %c0_54 = arith.constant 0 : index
    %154 = vector.load %arg14[%c0_52, %c0_53, %c0_54] : memref<2x1x64xf32, #tpu.memory_space<vmem>>, vector<1x1x64xf32>
    %155 = vector.shape_cast %154 : vector<1x1x64xf32> to vector<1x64xf32>
    %156 = arith.mulf %153, %153 : vector<8x64xf32>
    %cst_55 = arith.constant dense<0.000000e+00> : vector<8xf32>
    %157 = vector.multi_reduction <add>, %156, %cst_55 [1] : vector<8x64xf32> to vector<8xf32>
    %158 = vector.shape_cast %157 : vector<8xf32> to vector<8x1xf32>
    %cst_56 = arith.constant 6.400000e+01 : f32
    %159 = vector.broadcast %cst_56 : f32 to vector<8x1xf32>
    %160 = arith.divf %158, %159 : vector<8x1xf32>
    %cst_57 = arith.constant 9.99999997E-7 : f32
    %161 = vector.broadcast %cst_57 : f32 to vector<8x1xf32>
    %162 = arith.addf %160, %161 : vector<8x1xf32>
    %163 = math.rsqrt %162 : vector<8x1xf32>
    %164 = vector.broadcast %163 : vector<8x1xf32> to vector<8x64xf32>
    %165 = arith.mulf %153, %164 : vector<8x64xf32>
    %166 = vector.broadcast %155 : vector<1x64xf32> to vector<8x64xf32>
    %167 = arith.mulf %165, %166 : vector<8x64xf32>
    %c0_58 = arith.constant 0 : index
    %c0_59 = arith.constant 0 : index
    %c0_60 = arith.constant 0 : index
    %168 = vector.load %arg15[%c0_58, %c0_59, %c0_60] : memref<2x64x256xbf16, #tpu.memory_space<vmem>>, vector<1x64x256xbf16>
    %169 = vector.shape_cast %168 : vector<1x64x256xbf16> to vector<64x256xbf16>
    %170 = arith.truncf %167 : vector<8x64xf32> to vector<8x64xbf16>
    %cst_61 = arith.constant dense<0.000000e+00> : vector<8x256xf32>
    %171 = tpu.matmul %170, %169, %cst_61 {dimension_numbers = #tpu.dot_dimension_numbers<[1], [0], [0], [1], [0, 0, 1, 1], [], []>} : vector<8x64xbf16>, vector<64x256xbf16>, vector<8x256xf32> -> vector<8x256xf32>
    %172 = vector.extract_strided_slice %171 {offsets = [0, 0], sizes = [8, 128], strides = [1, 1]} : vector<8x256xf32> to vector<8x128xf32>
    %173 = vector.extract_strided_slice %171 {offsets = [0, 128], sizes = [8, 128], strides = [1, 1]} : vector<8x256xf32> to vector<8x128xf32>
    %174 = arith.negf %172 : vector<8x128xf32>
    %175 = math.exp %174 : vector<8x128xf32>
    %cst_62 = arith.constant 1.000000e+00 : f32
    %176 = vector.broadcast %cst_62 : f32 to vector<8x128xf32>
    %177 = arith.addf %176, %175 : vector<8x128xf32>
    %178 = arith.divf %176, %177 : vector<8x128xf32>
    %179 = arith.mulf %172, %178 : vector<8x128xf32>
    %180 = arith.mulf %179, %173 : vector<8x128xf32>
    %c0_63 = arith.constant 0 : index
    %c0_64 = arith.constant 0 : index
    %c0_65 = arith.constant 0 : index
    %181 = vector.load %arg16[%c0_63, %c0_64, %c0_65] : memref<2x128x64xbf16, #tpu.memory_space<vmem>>, vector<1x128x64xbf16>
    %182 = vector.shape_cast %181 : vector<1x128x64xbf16> to vector<128x64xbf16>
    %183 = arith.truncf %180 : vector<8x128xf32> to vector<8x128xbf16>
    %cst_66 = arith.constant dense<0.000000e+00> : vector<8x64xf32>
    %184 = tpu.matmul %183, %182, %cst_66 {dimension_numbers = #tpu.dot_dimension_numbers<[1], [0], [0], [1], [0, 0, 1, 1], [], []>} : vector<8x128xbf16>, vector<128x64xbf16>, vector<8x64xf32> -> vector<8x64xf32>
    %185 = arith.addf %153, %184 : vector<8x64xf32>
    %c1 = arith.constant 1 : index
    %c0_67 = arith.constant 0 : index
    %c0_68 = arith.constant 0 : index
    %186 = vector.load %arg9[%c1, %c0_67, %c0_68] : memref<2x1x64xf32, #tpu.memory_space<vmem>>, vector<1x1x64xf32>
    %187 = vector.shape_cast %186 : vector<1x1x64xf32> to vector<1x64xf32>
    %188 = arith.mulf %185, %185 : vector<8x64xf32>
    %cst_69 = arith.constant dense<0.000000e+00> : vector<8xf32>
    %189 = vector.multi_reduction <add>, %188, %cst_69 [1] : vector<8x64xf32> to vector<8xf32>
    %190 = vector.shape_cast %189 : vector<8xf32> to vector<8x1xf32>
    %cst_70 = arith.constant 6.400000e+01 : f32
    %191 = vector.broadcast %cst_70 : f32 to vector<8x1xf32>
    %192 = arith.divf %190, %191 : vector<8x1xf32>
    %cst_71 = arith.constant 9.99999997E-7 : f32
    %193 = vector.broadcast %cst_71 : f32 to vector<8x1xf32>
    %194 = arith.addf %192, %193 : vector<8x1xf32>
    %195 = math.rsqrt %194 : vector<8x1xf32>
    %196 = vector.broadcast %195 : vector<8x1xf32> to vector<8x64xf32>
    %197 = arith.mulf %185, %196 : vector<8x64xf32>
    %198 = vector.broadcast %187 : vector<1x64xf32> to vector<8x64xf32>
    %199 = arith.mulf %197, %198 : vector<8x64xf32>
    %c1_72 = arith.constant 1 : index
    %c0_73 = arith.constant 0 : index
    %c0_74 = arith.constant 0 : index
    %200 = vector.load %arg10[%c1_72, %c0_73, %c0_74] : memref<2x64x136xbf16, #tpu.memory_space<vmem>>, vector<1x64x136xbf16>
    %201 = vector.shape_cast %200 : vector<1x64x136xbf16> to vector<64x136xbf16>
    %202 = arith.truncf %199 : vector<8x64xf32> to vector<8x64xbf16>
    %cst_75 = arith.constant dense<0.000000e+00> : vector<8x136xf32>
    %203 = tpu.matmul %202, %201, %cst_75 {dimension_numbers = #tpu.dot_dimension_numbers<[1], [0], [0], [1], [0, 0, 1, 1], [], []>} : vector<8x64xbf16>, vector<64x136xbf16>, vector<8x136xf32> -> vector<8x136xf32>
    %204 = vector.extract_strided_slice %203 {offsets = [0, 0], sizes = [8, 64], strides = [1, 1]} : vector<8x136xf32> to vector<8x64xf32>
    %205 = vector.extract_strided_slice %203 {offsets = [0, 64], sizes = [8, 32], strides = [1, 1]} : vector<8x136xf32> to vector<8x32xf32>
    %c1_76 = arith.constant 1 : index
    %c0_77 = arith.constant 0 : index
    %c0_78 = arith.constant 0 : index
    %206 = vector.load %arg11[%c1_76, %c0_77, %c0_78] : memref<2x1x32xf32, #tpu.memory_space<vmem>>, vector<1x1x32xf32>
    %207 = vector.shape_cast %206 : vector<1x1x32xf32> to vector<1x32xf32>
    %208 = arith.mulf %205, %205 : vector<8x32xf32>
    %cst_79 = arith.constant dense<0.000000e+00> : vector<8xf32>
    %209 = vector.multi_reduction <add>, %208, %cst_79 [1] : vector<8x32xf32> to vector<8xf32>
    %210 = vector.shape_cast %209 : vector<8xf32> to vector<8x1xf32>
    %cst_80 = arith.constant 3.200000e+01 : f32
    %211 = vector.broadcast %cst_80 : f32 to vector<8x1xf32>
    %212 = arith.divf %210, %211 : vector<8x1xf32>
    %cst_81 = arith.constant 9.99999997E-7 : f32
    %213 = vector.broadcast %cst_81 : f32 to vector<8x1xf32>
    %214 = arith.addf %212, %213 : vector<8x1xf32>
    %215 = math.rsqrt %214 : vector<8x1xf32>
    %216 = vector.broadcast %215 : vector<8x1xf32> to vector<8x32xf32>
    %217 = arith.mulf %205, %216 : vector<8x32xf32>
    %218 = vector.broadcast %207 : vector<1x32xf32> to vector<8x32xf32>
    %219 = arith.mulf %217, %218 : vector<8x32xf32>
    %220 = vector.extract_strided_slice %203 {offsets = [0, 96], sizes = [8, 40], strides = [1, 1]} : vector<8x136xf32> to vector<8x40xf32>
    %221 = arith.mulf %220, %0 : vector<8x40xf32>
    %222 = arith.truncf %220 : vector<8x40xf32> to vector<8x40xbf16>
    %cst_82 = arith.constant dense<0.000000e+00> : vector<8x40xf32>
    %223 = tpu.matmul %222, %2, %cst_82 {dimension_numbers = #tpu.dot_dimension_numbers<[1], [0], [0], [1], [0, 0, 1, 1], [], []>} : vector<8x40xbf16>, vector<40x40xbf16>, vector<8x40xf32> -> vector<8x40xf32>
    %224 = arith.mulf %223, %1 : vector<8x40xf32>
    %225 = arith.addf %221, %224 : vector<8x40xf32>
    %226 = vector.extract_strided_slice %225 {offsets = [0, 0], sizes = [8, 32], strides = [1, 1]} : vector<8x40xf32> to vector<8x32xf32>
    %227 = vector.extract_strided_slice %225 {offsets = [0, 32], sizes = [8, 8], strides = [1, 1]} : vector<8x40xf32> to vector<8x8xf32>
    %c1_83 = arith.constant 1 : index
    %c0_84 = arith.constant 0 : index
    %c0_85 = arith.constant 0 : index
    %228 = vector.load %arg12[%c1_83, %c0_84, %c0_85] : memref<2x32x128xbf16, #tpu.memory_space<vmem>>, vector<1x32x128xbf16>
    %229 = vector.shape_cast %228 : vector<1x32x128xbf16> to vector<32x128xbf16>
    %230 = arith.truncf %219 : vector<8x32xf32> to vector<8x32xbf16>
    %cst_86 = arith.constant dense<0.000000e+00> : vector<8x128xf32>
    %231 = tpu.matmul %230, %229, %cst_86 {dimension_numbers = #tpu.dot_dimension_numbers<[1], [0], [0], [1], [0, 0, 1, 1], [], []>} : vector<8x32xbf16>, vector<32x128xbf16>, vector<8x128xf32> -> vector<8x128xf32>
    %232 = vector.extract_strided_slice %231 {offsets = [0, 0], sizes = [8, 64], strides = [1, 1]} : vector<8x128xf32> to vector<8x64xf32>
    %233 = vector.extract_strided_slice %231 {offsets = [0, 64], sizes = [8, 64], strides = [1, 1]} : vector<8x128xf32> to vector<8x64xf32>
    %234 = vector.extract_strided_slice %204 {offsets = [0, 0], sizes = [8, 16], strides = [1, 1]} : vector<8x64xf32> to vector<8x16xf32>
    %235 = vector.extract_strided_slice %226 {offsets = [0, 0], sizes = [8, 8], strides = [1, 1]} : vector<8x32xf32> to vector<8x8xf32>
    %236 = tpu.concatenate %234, %235 in 1 : vector<8x16xf32>, vector<8x8xf32> -> vector<8x24xf32>
    %237 = vector.extract_strided_slice %204 {offsets = [0, 16], sizes = [8, 16], strides = [1, 1]} : vector<8x64xf32> to vector<8x16xf32>
    %238 = vector.extract_strided_slice %226 {offsets = [0, 8], sizes = [8, 8], strides = [1, 1]} : vector<8x32xf32> to vector<8x8xf32>
    %239 = tpu.concatenate %237, %238 in 1 : vector<8x16xf32>, vector<8x8xf32> -> vector<8x24xf32>
    %240 = vector.extract_strided_slice %204 {offsets = [0, 32], sizes = [8, 16], strides = [1, 1]} : vector<8x64xf32> to vector<8x16xf32>
    %241 = vector.extract_strided_slice %226 {offsets = [0, 16], sizes = [8, 8], strides = [1, 1]} : vector<8x32xf32> to vector<8x8xf32>
    %242 = tpu.concatenate %240, %241 in 1 : vector<8x16xf32>, vector<8x8xf32> -> vector<8x24xf32>
    %243 = vector.extract_strided_slice %204 {offsets = [0, 48], sizes = [8, 16], strides = [1, 1]} : vector<8x64xf32> to vector<8x16xf32>
    %244 = vector.extract_strided_slice %226 {offsets = [0, 24], sizes = [8, 8], strides = [1, 1]} : vector<8x32xf32> to vector<8x8xf32>
    %245 = tpu.concatenate %243, %244 in 1 : vector<8x16xf32>, vector<8x8xf32> -> vector<8x24xf32>
    %246 = vector.shape_cast %236 : vector<8x24xf32> to vector<1x8x24xf32>
    %247 = vector.shape_cast %239 : vector<8x24xf32> to vector<1x8x24xf32>
    %248 = vector.shape_cast %242 : vector<8x24xf32> to vector<1x8x24xf32>
    %249 = vector.shape_cast %245 : vector<8x24xf32> to vector<1x8x24xf32>
    %250 = tpu.concatenate %246, %247, %248, %249 in 0 : vector<1x8x24xf32>, vector<1x8x24xf32>, vector<1x8x24xf32>, vector<1x8x24xf32> -> vector<4x8x24xf32>
    %251 = vector.extract_strided_slice %232 {offsets = [0, 0], sizes = [8, 16], strides = [1, 1]} : vector<8x64xf32> to vector<8x16xf32>
    %252 = tpu.concatenate %251, %227 in 1 : vector<8x16xf32>, vector<8x8xf32> -> vector<8x24xf32>
    %253 = vector.extract_strided_slice %232 {offsets = [0, 16], sizes = [8, 16], strides = [1, 1]} : vector<8x64xf32> to vector<8x16xf32>
    %254 = tpu.concatenate %253, %227 in 1 : vector<8x16xf32>, vector<8x8xf32> -> vector<8x24xf32>
    %255 = vector.extract_strided_slice %232 {offsets = [0, 32], sizes = [8, 16], strides = [1, 1]} : vector<8x64xf32> to vector<8x16xf32>
    %256 = tpu.concatenate %255, %227 in 1 : vector<8x16xf32>, vector<8x8xf32> -> vector<8x24xf32>
    %257 = vector.extract_strided_slice %232 {offsets = [0, 48], sizes = [8, 16], strides = [1, 1]} : vector<8x64xf32> to vector<8x16xf32>
    %258 = tpu.concatenate %257, %227 in 1 : vector<8x16xf32>, vector<8x8xf32> -> vector<8x24xf32>
    %259 = vector.shape_cast %252 : vector<8x24xf32> to vector<1x8x24xf32>
    %260 = vector.shape_cast %254 : vector<8x24xf32> to vector<1x8x24xf32>
    %261 = vector.shape_cast %256 : vector<8x24xf32> to vector<1x8x24xf32>
    %262 = vector.shape_cast %258 : vector<8x24xf32> to vector<1x8x24xf32>
    %263 = tpu.concatenate %259, %260, %261, %262 in 0 : vector<1x8x24xf32>, vector<1x8x24xf32>, vector<1x8x24xf32>, vector<1x8x24xf32> -> vector<4x8x24xf32>
    %264 = vector.extract_strided_slice %233 {offsets = [0, 0], sizes = [8, 16], strides = [1, 1]} : vector<8x64xf32> to vector<8x16xf32>
    %265 = vector.extract_strided_slice %233 {offsets = [0, 16], sizes = [8, 16], strides = [1, 1]} : vector<8x64xf32> to vector<8x16xf32>
    %266 = vector.extract_strided_slice %233 {offsets = [0, 32], sizes = [8, 16], strides = [1, 1]} : vector<8x64xf32> to vector<8x16xf32>
    %267 = vector.extract_strided_slice %233 {offsets = [0, 48], sizes = [8, 16], strides = [1, 1]} : vector<8x64xf32> to vector<8x16xf32>
    %268 = vector.shape_cast %264 : vector<8x16xf32> to vector<1x8x16xf32>
    %269 = vector.shape_cast %265 : vector<8x16xf32> to vector<1x8x16xf32>
    %270 = vector.shape_cast %266 : vector<8x16xf32> to vector<1x8x16xf32>
    %271 = vector.shape_cast %267 : vector<8x16xf32> to vector<1x8x16xf32>
    %272 = tpu.concatenate %268, %269, %270, %271 in 0 : vector<1x8x16xf32>, vector<1x8x16xf32>, vector<1x8x16xf32>, vector<1x8x16xf32> -> vector<4x8x16xf32>
    %273 = arith.truncf %250 : vector<4x8x24xf32> to vector<4x8x24xbf16>
    %274 = arith.truncf %263 : vector<4x8x24xf32> to vector<4x8x24xbf16>
    "tpu.trace_start"() <{level = 10 : i32, message = "hqd,hkd->hqk"}> : () -> ()
    %cst_87 = arith.constant dense<0.000000e+00> : vector<4x8x8xf32>
    %275 = tpu.matmul %273, %274, %cst_87 {dimension_numbers = #tpu.dot_dimension_numbers<[2], [2], [1], [1], [0, 0, 0, 1, 1, 1], [0], [0]>} : vector<4x8x24xbf16>, vector<4x8x24xbf16>, vector<4x8x8xf32> -> vector<4x8x8xf32>
    "tpu.trace_stop"() : () -> ()
    %cst_88 = arith.constant 0.204124153 : f32
    %276 = vector.broadcast %cst_88 : f32 to vector<4x8x8xf32>
    %277 = arith.mulf %275, %276 : vector<4x8x8xf32>
    %278 = vector.broadcast %8 : vector<1x1x8xf32> to vector<4x8x8xf32>
    %279 = arith.addf %277, %278 : vector<4x8x8xf32>
    %cst_89 = arith.constant dense<0xFF800000> : vector<4x8xf32>
    %280 = vector.multi_reduction <maximumf>, %279, %cst_89 [2] : vector<4x8x8xf32> to vector<4x8xf32>
    %281 = vector.shape_cast %280 : vector<4x8xf32> to vector<4x8x1xf32>
    %282 = vector.broadcast %281 : vector<4x8x1xf32> to vector<4x8x8xf32>
    %283 = arith.subf %279, %282 : vector<4x8x8xf32>
    %284 = math.exp %283 : vector<4x8x8xf32>
    %cst_90 = arith.constant dense<0.000000e+00> : vector<4x8xf32>
    %285 = vector.multi_reduction <add>, %284, %cst_90 [2] : vector<4x8x8xf32> to vector<4x8xf32>
    %286 = vector.shape_cast %285 : vector<4x8xf32> to vector<4x8x1xf32>
    %287 = arith.truncf %284 : vector<4x8x8xf32> to vector<4x8x8xbf16>
    %288 = arith.truncf %272 : vector<4x8x16xf32> to vector<4x8x16xbf16>
    "tpu.trace_start"() <{level = 10 : i32, message = "hqk,hkd->hqd"}> : () -> ()
    %cst_91 = arith.constant dense<0.000000e+00> : vector<4x8x16xf32>
    %289 = tpu.matmul %287, %288, %cst_91 {dimension_numbers = #tpu.dot_dimension_numbers<[2], [1], [1], [2], [0, 0, 0, 1, 1, 2], [0], [0]>} : vector<4x8x8xbf16>, vector<4x8x16xbf16>, vector<4x8x16xf32> -> vector<4x8x16xf32>
    "tpu.trace_stop"() : () -> ()
    %290 = tpu.reciprocal %286 {approx = true} : vector<4x8x1xf32> -> vector<4x8x1xf32>
    %291 = vector.broadcast %290 : vector<4x8x1xf32> to vector<4x8x16xf32>
    %292 = arith.mulf %289, %291 : vector<4x8x16xf32>
    %293 = vector.extract_strided_slice %292 {offsets = [0, 0, 0], sizes = [1, 8, 16], strides = [1, 1, 1]} : vector<4x8x16xf32> to vector<1x8x16xf32>
    %294 = vector.shape_cast %293 : vector<1x8x16xf32> to vector<8x16xf32>
    %295 = vector.extract_strided_slice %292 {offsets = [1, 0, 0], sizes = [1, 8, 16], strides = [1, 1, 1]} : vector<4x8x16xf32> to vector<1x8x16xf32>
    %296 = vector.shape_cast %295 : vector<1x8x16xf32> to vector<8x16xf32>
    %297 = vector.extract_strided_slice %292 {offsets = [2, 0, 0], sizes = [1, 8, 16], strides = [1, 1, 1]} : vector<4x8x16xf32> to vector<1x8x16xf32>
    %298 = vector.shape_cast %297 : vector<1x8x16xf32> to vector<8x16xf32>
    %299 = vector.extract_strided_slice %292 {offsets = [3, 0, 0], sizes = [1, 8, 16], strides = [1, 1, 1]} : vector<4x8x16xf32> to vector<1x8x16xf32>
    %300 = vector.shape_cast %299 : vector<1x8x16xf32> to vector<8x16xf32>
    %301 = tpu.concatenate %294, %296, %298, %300 in 1 : vector<8x16xf32>, vector<8x16xf32>, vector<8x16xf32>, vector<8x16xf32> -> vector<8x64xf32>
    %c1_92 = arith.constant 1 : index
    %c0_93 = arith.constant 0 : index
    %c0_94 = arith.constant 0 : index
    %302 = vector.load %arg13[%c1_92, %c0_93, %c0_94] : memref<2x64x64xbf16, #tpu.memory_space<vmem>>, vector<1x64x64xbf16>
    %303 = vector.shape_cast %302 : vector<1x64x64xbf16> to vector<64x64xbf16>
    %304 = arith.truncf %301 : vector<8x64xf32> to vector<8x64xbf16>
    %cst_95 = arith.constant dense<0.000000e+00> : vector<8x64xf32>
    %305 = tpu.matmul %304, %303, %cst_95 {dimension_numbers = #tpu.dot_dimension_numbers<[1], [0], [0], [1], [0, 0, 1, 1], [], []>} : vector<8x64xbf16>, vector<64x64xbf16>, vector<8x64xf32> -> vector<8x64xf32>
    %306 = arith.addf %185, %305 : vector<8x64xf32>
    %c1_96 = arith.constant 1 : index
    %c0_97 = arith.constant 0 : index
    %c0_98 = arith.constant 0 : index
    %307 = vector.load %arg14[%c1_96, %c0_97, %c0_98] : memref<2x1x64xf32, #tpu.memory_space<vmem>>, vector<1x1x64xf32>
    %308 = vector.shape_cast %307 : vector<1x1x64xf32> to vector<1x64xf32>
    %309 = arith.mulf %306, %306 : vector<8x64xf32>
    %cst_99 = arith.constant dense<0.000000e+00> : vector<8xf32>
    %310 = vector.multi_reduction <add>, %309, %cst_99 [1] : vector<8x64xf32> to vector<8xf32>
    %311 = vector.shape_cast %310 : vector<8xf32> to vector<8x1xf32>
    %cst_100 = arith.constant 6.400000e+01 : f32
    %312 = vector.broadcast %cst_100 : f32 to vector<8x1xf32>
    %313 = arith.divf %311, %312 : vector<8x1xf32>
    %cst_101 = arith.constant 9.99999997E-7 : f32
    %314 = vector.broadcast %cst_101 : f32 to vector<8x1xf32>
    %315 = arith.addf %313, %314 : vector<8x1xf32>
    %316 = math.rsqrt %315 : vector<8x1xf32>
    %317 = vector.broadcast %316 : vector<8x1xf32> to vector<8x64xf32>
    %318 = arith.mulf %306, %317 : vector<8x64xf32>
    %319 = vector.broadcast %308 : vector<1x64xf32> to vector<8x64xf32>
    %320 = arith.mulf %318, %319 : vector<8x64xf32>
    %c1_102 = arith.constant 1 : index
    %c0_103 = arith.constant 0 : index
    %c0_104 = arith.constant 0 : index
    %321 = vector.load %arg15[%c1_102, %c0_103, %c0_104] : memref<2x64x256xbf16, #tpu.memory_space<vmem>>, vector<1x64x256xbf16>
    %322 = vector.shape_cast %321 : vector<1x64x256xbf16> to vector<64x256xbf16>
    %323 = arith.truncf %320 : vector<8x64xf32> to vector<8x64xbf16>
    %cst_105 = arith.constant dense<0.000000e+00> : vector<8x256xf32>
    %324 = tpu.matmul %323, %322, %cst_105 {dimension_numbers = #tpu.dot_dimension_numbers<[1], [0], [0], [1], [0, 0, 1, 1], [], []>} : vector<8x64xbf16>, vector<64x256xbf16>, vector<8x256xf32> -> vector<8x256xf32>
    %325 = vector.extract_strided_slice %324 {offsets = [0, 0], sizes = [8, 128], strides = [1, 1]} : vector<8x256xf32> to vector<8x128xf32>
    %326 = vector.extract_strided_slice %324 {offsets = [0, 128], sizes = [8, 128], strides = [1, 1]} : vector<8x256xf32> to vector<8x128xf32>
    %327 = arith.negf %325 : vector<8x128xf32>
    %328 = math.exp %327 : vector<8x128xf32>
    %cst_106 = arith.constant 1.000000e+00 : f32
    %329 = vector.broadcast %cst_106 : f32 to vector<8x128xf32>
    %330 = arith.addf %329, %328 : vector<8x128xf32>
    %331 = arith.divf %329, %330 : vector<8x128xf32>
    %332 = arith.mulf %325, %331 : vector<8x128xf32>
    %333 = arith.mulf %332, %326 : vector<8x128xf32>
    %c1_107 = arith.constant 1 : index
    %c0_108 = arith.constant 0 : index
    %c0_109 = arith.constant 0 : index
    %334 = vector.load %arg16[%c1_107, %c0_108, %c0_109] : memref<2x128x64xbf16, #tpu.memory_space<vmem>>, vector<1x128x64xbf16>
    %335 = vector.shape_cast %334 : vector<1x128x64xbf16> to vector<128x64xbf16>
    %336 = arith.truncf %333 : vector<8x128xf32> to vector<8x128xbf16>
    %cst_110 = arith.constant dense<0.000000e+00> : vector<8x64xf32>
    %337 = tpu.matmul %336, %335, %cst_110 {dimension_numbers = #tpu.dot_dimension_numbers<[1], [0], [0], [1], [0, 0, 1, 1], [], []>} : vector<8x128xbf16>, vector<128x64xbf16>, vector<8x64xf32> -> vector<8x64xf32>
    %338 = arith.addf %306, %337 : vector<8x64xf32>
    %339 = vector.extract_strided_slice %338 {offsets = [1, 0], sizes = [4, 64], strides = [1, 1]} : vector<8x64xf32> to vector<4x64xf32>
    %c0_111 = arith.constant 0 : index
    %c0_112 = arith.constant 0 : index
    %c0_113 = arith.constant 0 : index
    %340 = vector.load %arg17[%c0_111, %c0_112, %c0_113] : memref<1x4x64xf32, #tpu.memory_space<vmem>>, vector<1x4x64xf32>
    %341 = vector.shape_cast %340 : vector<1x4x64xf32> to vector<4x64xf32>
    %342 = vector.shape_cast %339 : vector<4x64xf32> to vector<1x4x64xf32>
    tpu.vector_store %arg17[%c0_111, %c0_112, %c0_113], %342 {strides = array<i32>} : memref<1x4x64xf32, #tpu.memory_space<vmem>>, vector<1x4x64xf32>,
    return
  }
  func.func @transform_0(%arg0: i32) -> (i32, i32, i32) {
    %c0_i32 = arith.constant 0 : i32
    %c0_i32_0 = arith.constant 0 : i32
    %c0_i32_1 = arith.constant 0 : i32
    return %arg0, %c0_i32, %c0_i32_0 : i32, i32, i32
  }
  func.func @transform_1(%arg0: i32) -> (i32, i32) {
    %c0_i32 = arith.constant 0 : i32
    %c0_i32_0 = arith.constant 0 : i32
    %c0_i32_1 = arith.constant 0 : i32
    return %c0_i32, %c0_i32_0 : i32, i32
  }
  func.func @transform_2(%arg0: i32) -> (i32, i32) {
    %c0_i32 = arith.constant 0 : i32
    %c0_i32_0 = arith.constant 0 : i32
    %c0_i32_1 = arith.constant 0 : i32
    return %c0_i32, %c0_i32_0 : i32, i32
  }
  func.func @transform_3(%arg0: i32) -> (i32, i32) {
    %c0_i32 = arith.constant 0 : i32
    %c0_i32_0 = arith.constant 0 : i32
    %c0_i32_1 = arith.constant 0 : i32
    return %c0_i32, %c0_i32_0 : i32, i32
  }
  func.func @transform_4(%arg0: i32) -> (i32, i32) {
    %c0_i32 = arith.constant 0 : i32
    %c0_i32_0 = arith.constant 0 : i32
    %c0_i32_1 = arith.constant 0 : i32
    return %c0_i32, %c0_i32_0 : i32, i32
  }
  func.func @transform_5(%arg0: i32) -> (i32, i32) {
    %c0_i32 = arith.constant 0 : i32
    %c0_i32_0 = arith.constant 0 : i32
    %c0_i32_1 = arith.constant 0 : i32
    return %c0_i32, %c0_i32_0 : i32, i32
  }
  func.func @transform_6(%arg0: i32) -> (i32, i32) {
    %c0_i32 = arith.constant 0 : i32
    %c0_i32_0 = arith.constant 0 : i32
    %c0_i32_1 = arith.constant 0 : i32
    return %c0_i32, %c0_i32_0 : i32, i32
  }
  func.func @transform_7(%arg0: i32) -> (i32, i32) {
    %c0_i32 = arith.constant 0 : i32
    %c0_i32_0 = arith.constant 0 : i32
    %c0_i32_1 = arith.constant 0 : i32
    return %c0_i32, %c0_i32_0 : i32, i32
  }
  func.func @transform_8(%arg0: i32) -> (i32, i32, i32) {
    %c0_i32 = arith.constant 0 : i32
    %c0_i32_0 = arith.constant 0 : i32
    %c0_i32_1 = arith.constant 0 : i32
    %c0_i32_2 = arith.constant 0 : i32
    return %c0_i32, %c0_i32_0, %c0_i32_1 : i32, i32, i32
  }
  func.func @transform_9(%arg0: i32) -> (i32, i32, i32) {
    %c0_i32 = arith.constant 0 : i32
    %c0_i32_0 = arith.constant 0 : i32
    %c0_i32_1 = arith.constant 0 : i32
    %c0_i32_2 = arith.constant 0 : i32
    return %c0_i32, %c0_i32_0, %c0_i32_1 : i32, i32, i32
  }
  func.func @transform_10(%arg0: i32) -> (i32, i32, i32) {
    %c0_i32 = arith.constant 0 : i32
    %c0_i32_0 = arith.constant 0 : i32
    %c0_i32_1 = arith.constant 0 : i32
    %c0_i32_2 = arith.constant 0 : i32
    return %c0_i32, %c0_i32_0, %c0_i32_1 : i32, i32, i32
  }
  func.func @transform_11(%arg0: i32) -> (i32, i32, i32) {
    %c0_i32 = arith.constant 0 : i32
    %c0_i32_0 = arith.constant 0 : i32
    %c0_i32_1 = arith.constant 0 : i32
    %c0_i32_2 = arith.constant 0 : i32
    return %c0_i32, %c0_i32_0, %c0_i32_1 : i32, i32, i32
  }
  func.func @transform_12(%arg0: i32) -> (i32, i32, i32) {
    %c0_i32 = arith.constant 0 : i32
    %c0_i32_0 = arith.constant 0 : i32
    %c0_i32_1 = arith.constant 0 : i32
    %c0_i32_2 = arith.constant 0 : i32
    return %c0_i32, %c0_i32_0, %c0_i32_1 : i32, i32, i32
  }
  func.func @transform_13(%arg0: i32) -> (i32, i32, i32) {
    %c0_i32 = arith.constant 0 : i32
    %c0_i32_0 = arith.constant 0 : i32
    %c0_i32_1 = arith.constant 0 : i32
    %c0_i32_2 = arith.constant 0 : i32
    return %c0_i32, %c0_i32_0, %c0_i32_1 : i32, i32, i32
  }
  func.func @transform_14(%arg0: i32) -> (i32, i32, i32) {
    %c0_i32 = arith.constant 0 : i32
    %c0_i32_0 = arith.constant 0 : i32
    %c0_i32_1 = arith.constant 0 : i32
    %c0_i32_2 = arith.constant 0 : i32
    return %c0_i32, %c0_i32_0, %c0_i32_1 : i32, i32, i32
  }
  func.func @transform_15(%arg0: i32) -> (i32, i32, i32) {
    %c0_i32 = arith.constant 0 : i32
    %c0_i32_0 = arith.constant 0 : i32
    %c0_i32_1 = arith.constant 0 : i32
    %c0_i32_2 = arith.constant 0 : i32
    return %c0_i32, %c0_i32_0, %c0_i32_1 : i32, i32, i32
  }
  func.func @transform_16(%arg0: i32) -> (i32, i32, i32) {
    %c0_i32 = arith.constant 0 : i32
    %c0_i32_0 = arith.constant 0 : i32
    %c0_i32_1 = arith.constant 0 : i32
    return %arg0, %c0_i32, %c0_i32_0 : i32, i32, i32
  }
}

</mosaic_0001>

<bundles_post_ra>
// kernel: vit_forward.1
= control target key start
LH: loop header
LB: loop body
LE: loop exit
PB: predicated region body
PF: predicated region fallthrough
CT: control target
= control target key end

     0   :  { %s4495_s0 = inlined_call_operand.vmem [shape: f32[2,4,192], index: 0, kind: input, shape index: {}]   ;;  %s4496_s1 = inlined_call_operand.vmem [shape: f32[1,192], index: 1, kind: input, shape index: {}]   ;;  %s4497_s2 = inlined_call_operand.vmem [shape: bf16[192,64], index: 2, kind: input, shape index: {}]   ;;  %s4498_s3 = inlined_call_operand.vmem [shape: f32[1,64], index: 3, kind: input, shape index: {}]   ;;  %s4499_s4 = inlined_call_operand.vmem [shape: f32[1,64], index: 4, kind: input, shape index: {}]   ;;  %s4500_s5 = inlined_call_operand.vmem [shape: f32[8,40], index: 5, kind: input, shape index: {}]   ;;  %s4501_s6 = inlined_call_operand.vmem [shape: f32[8,40], index: 6, kind: input, shape index: {}]   ;;  %s4502_s7 = inlined_call_operand.vmem [shape: bf16[40,40], index: 7, kind: input, shape index: {}]   ;;  %s4503_s8 = inlined_call_operand.vmem [shape: f32[2,1,64], index: 8, kind: input, shape index: {}]   ;;  %s4504_s9 = inlined_call_operand.vmem [shape: bf16[2,64,136], index: 9, kind: input, shape index: {}]   ;;  %s4505_s10 = inlined_call_operand.vmem [shape: f32[2,1,32], index: 10, kind: input, shape index: {}]   ;;  %s4506_s11 = inlined_call_operand.vmem [shape: bf16[2,32,128], index: 11, kind: input, shape index: {}]   ;;  %s4507_s12 = inlined_call_operand.vmem [shape: bf16[2,64,64], index: 12, kind: input, shape index: {}]   ;;  %s4508_s13 = inlined_call_operand.vmem [shape: f32[2,1,64], index: 13, kind: input, shape index: {}]   ;;  %s4509_s14 = inlined_call_operand.vmem [shape: bf16[2,64,256], index: 14, kind: input, shape index: {}]   ;;  %s4510_s15 = inlined_call_operand.vmem [shape: bf16[2,128,64], index: 15, kind: input, shape index: {}]   ;;  %s4511_s16 = inlined_call_operand.hbm [shape: f32[2,4,64], index: 16, kind: output, shape index: {}]  }
   0x1   :  { %4532 = sst [smem:[#allocation9_spill]] %s4495_s0 }
   0x2   :  { %21 = vsyncpa [#allocation3], 0 }
   0x3   :  { %23 = vsyncpa [#allocation3 + $0x1], 0  ;;  %s3773_s21 = smov 0   ;;  %s3775_s22 = smov 0  }
   0x4   :  { %s3777_s23 = smov 0   ;;  %s3779_s24 = smov 0  }
   0x5 LB: > { %4533 = sst [smem:[#allocation5_spill]] %s3667_s23  ;;  %s3794_s25 = sadd.s32 4294967295, %s3671_s24   ;;  %s3671_s24 = sphi %s3779_s24, %s4550_s24   ;;  %s3667_s23 = sphi %s3777_s23, %s4552_s23   ;;  %s3663_s22 = sphi %s3775_s22, %s4554_s22   ;;  %s3659_s21 = sphi %s3773_s21, %s4553_s21  }
   0x6   : > { %s2971_s26 = sadd.s32 4294967294, %s3671_s24   ;;  %s3798_s27 = sadd.s32 1, %s3671_s24  }
   0x7   : > { %4534 = sst [smem:[#allocation6_spill]] %s3798_s27  ;;  %s377_s28 = sadd.s32 1, %s3667_s23 }
   0x8   : > { %s374_s29 = ssub.s32 %s3671_s24, %s3798_s27  ;;  %p387_p0 = scmp.ne.s32.totalorder %s3667_s23, %s3663_s22 }
   0x9   : > { %p375_p1 = scmp.eq.s32.totalorder %s374_s29, 0  ;;  %p388_p2 = scmp.eq.s32.totalorder %s3794_s25, 1 }
   0xa   : > { %p393_p3 = scmp.ne.s32.totalorder %s3663_s22, %s3659_s21  ;;  %p394_p4 = scmp.eq.s32.totalorder %s2971_s26, 1 }
   0xb   : > { %s3809_s30 = scalar_select %p375_p1, %s3667_s23, %s377_s28  }
   0xc   : > { %p3811_p5 = por %p388_p2, %p387_p0  ;;  %p3815_p6 = por %p394_p4, %p393_p3 }
   0xd   : > { %4535 = sst [smem:[#allocation7_spill]] %s3809_s30  ;;  %p2974_p7 = scmp.ge.s32.totalorder %s3671_s24, 1 }
   0xe   : > { %s4537_s17 = scalar_select %p3815_p6, 1, 0 }
   0xf   : > { %p465_p8 = scmp.lt.s32.totalorder %s3671_s24, 3 }
  0x10   : > { %4538 = sst [smem:[#allocation8_spill]] %s4537_s17 }
  0x11   : > { %p466_p9 = pnand %p2974_p7, %p465_p8 }
  0x12   : > { %p515_p10 = scmp.lt.s32.totalorder (!%p466_p9), %s3794_s25, 1  ;;  %v3673_v0 = vmov (!%p466_p9), 0   ;;  %v3464_v1 = vld [vmem:[%s4497_s2] sm:$0xff] (!%p466_p9)   ;;  %v3465_v2 = vld [vmem:[%s4497_s2 + $0x8] sm:$0xff] (!%p466_p9)   ;;  %s4539_s27 = sld [smem:[#allocation9_spill]] (!%p466_p9)  ;;  %vm538_vm0 = vcmask (!%p466_p9), 1043456   ;;  %v528_v20 = vlaneseq (!%p466_p9) }
  0x13   : > { %469 = sbr.rel (%p466_p9) target bundleno = 5774 (0x168e), region = 84  ;;  %683 = vmatprep.subr.bf16.mxu0 (!%p466_p9), %v3673_v0  ;;  %832 = vmatprep.mubr.bf16.mxu1 (!%p466_p9), %v3673_v0  ;;  %vm540_vm1 = vcmask (!%p466_p9), 519168   ;;  %v3466_v4 = vld [vmem:[%s4497_s2 + $0x10] sm:$0xff] (!%p466_p9)   ;;  %v3467_v8 = vld [vmem:[%s4497_s2 + $0x18] sm:$0xff] (!%p466_p9)   ;;  %v3468_v11 = vld [vmem:[%s4497_s2 + $0x20] sm:$0xff] (!%p466_p9)   ;;  %vm679_vm2 = vcmask (!%p466_p9), 523264  }
  0x14   : > { %684 = vmatpush1.bf16.msra.mxu0 (!%p466_p9), %v3464_v1  ;;  %v3469_v12 = vld [vmem:[%s4497_s2 + $0x28] sm:$0xff] (!%p466_p9)   ;;  %v3470_v13 = vld [vmem:[%s4497_s2 + $0x30] sm:$0xff] (!%p466_p9)   ;;  %v3471_v14 = vld [vmem:[%s4497_s2 + $0x38] sm:$0xff] (!%p466_p9)   ;;  %v3674_v23 = vmov (!%p466_p9), 839922192   ;;  %v554_v25 = vshrl.u32 (!%p466_p9), %v528_v20, 7 }
  0x15   : > { %685 = vmatprep.subr.bf16.mxu0 (!%p466_p9), %v3673_v0  ;;  %v3472_v15 = vld [vmem:[%s4497_s2 + $0x40] sm:$0xff] (!%p466_p9)   ;;  %v3473_v16 = vld [vmem:[%s4497_s2 + $0x48] sm:$0xff] (!%p466_p9)   ;;  %v3474_v17 = vld [vmem:[%s4497_s2 + $0x50] sm:$0xff] (!%p466_p9)   ;;  %v551_v24 = vunpack.c.l.s4 (!%p466_p9), %v3674_v23  ;;  %vm727_vm3 = vcmask (!%p466_p9), 1040384   ;;  %vm729_vm4 = vcmask (!%p466_p9), 1044480   ;;  %vm3676_vm5 = vmmov (!%p466_p9), 0  }
  0x16   : > { %v3475_v18 = vld [vmem:[%s4497_s2 + $0x58] sm:$0xff] (!%p466_p9)   ;;  %v562_v27 = vsub.s32 (!%p466_p9), 0, %v554_v25  ;;  %v566_v28 = vsub.s32 (!%p466_p9), 1, %v554_v25  ;;  %v533_v29 = vld [vmem:[%s4496_s1] sm:$0x3] (!%p466_p9)  ;;  %s4530_s18 = smov (!%p466_p9), 32  }
  0x17   : > { %v552_v26 = vunpack.c.0.s8 (!%p466_p9), %v551_v24  ;;  %v2978_v41 = vld [vmem:[%s4498_s3] ss:$0 sm:$0xff] (!%p466_p9)  ;;  %v3476_v53 = vld [vmem:[%s4504_s9 + $0x4] ss:$8 sps:$4 sm:$0xff] (!%p466_p9)   ;;  %v3479_v55 = vld [vmem:[%s4504_s9 + $0x14] ss:$8 sps:$4 sm:$0xff] (!%p466_p9)  }
  0x18   : > { %686 = vmatpush1.bf16.msra.mxu0 (!%p466_p9), %v3465_v2  ;;  %v563_v31 = vrot.slane (!%p466_p9), %v533_v29, %v562_v27  ;;  %v567_v32 = vrot.slane (!%p466_p9), %v533_v29, %v566_v28  ;;  %v723_v45 = vld [vmem:[%s4499_s4] sm:$0x1] (!%p466_p9)  ;;  %800 = vmatprep.subr.bf16.mxu1 (!%p466_p9), %v3476_v53  ;;  %v3481_v56 = vld [vmem:[%s4504_s9 + $0x10] ss:$8 sps:$4 sm:$0xff] (!%p466_p9)   ;;  %v3482_v57 = vld [vmem:[%s4504_s9 + $0x24] ss:$8 sps:$4 sm:$0xff] (!%p466_p9)  }
  0x19   : > { %687 = vmatprep.subr.bf16.mxu0 (!%p466_p9), %v3673_v0  ;;  %v555_v30 = vsub.s32 (!%p466_p9), %v552_v26, %v554_v25  ;;  %v3478_v54 = vld [vmem:[%s4504_s9] ss:$8 sps:$4 sm:$0xff] (!%p466_p9)   ;;  %v3485_v59 = vld [vmem:[%s4504_s9 + $0x34] ss:$8 sps:$4 sm:$0xff] (!%p466_p9)   ;;  %v3487_v60 = vld [vmem:[%s4504_s9 + $0x30] ss:$8 sps:$4 sm:$0xff] (!%p466_p9)  }
  0x1a   : > { %s516_s20 = scalar_select %p515_p10, %s3794_s25, 1  ;;  %v568_v35 = vcombine.low %v563_v31, %v567_v32  ;;  %801 = vmatpush1.bf16.msra.mxu1 %v3478_v54  ;;  %v3484_v58 = vld [vmem:[%s4504_s9 + $0x20] ss:$8 sps:$4 sm:$0xff]   ;;  %vm847_vm6 = vcmask 261120   ;;  %vm896_vm7 = vcmask 326656   ;;  %vm1017_vm8 = vcmask 130048  }
  0x1b   : > { %802 = vmatprep.subr.bf16.mxu1 %v3479_v55  ;;  %v2992_v2 = vld [vmem:[%s4503_s8] ss:$0 sm:$0xff]  ;;  %s4528_s19 = smov 64   ;;  %s4522_s30 = smov 96   ;;  %v3492_v27 = vld [vmem:[%s4506_s11 + $0x8] sm:$0xff]   ;;  %vm1067_vm9 = vcmask 195584  }
  0x1c   : > { %s3140_s29 = sshll.u32 %s516_s20, 3  ;;  %688 = vmatpush1.bf16.msra.mxu0 %v3466_v4  ;;  %v521_v25 = vld [vmem:[%s4500_s5] sm:$0xff]  ;;  %s4520_s28 = smov 112   ;;  %vm1260_vm11 = vcmask 64512   ;;  %vm1523_vm12 = vcmask 392192   ;;  %vm2896_vm13 = vcmask 520193  }
  0x1d   : > { %s519_s17 = scalar_lea.vmem %s4539_s27, %s3140_s29  ;;  %689 = vmatprep.subr.bf16.mxu0 %v3673_v0  ;;  %v3491_v26 = vld [vmem:[%s4506_s11] sm:$0xff]   ;;  %s4526_s27 = smov 16  }
  0x1e   : > { %v532_v3 = vld [vmem:[%s519_s17] sm:$0xff]  ;;  %803 = vmatpush1.bf16.msra.mxu1 %v3481_v56  ;;  %s4524_s17 = smov 48   ;;  %s4517_s29 = smov 40  }
  0x1f   : > { %v534_v5 = vmul.f32 %v532_v3, %v532_v3  ;;  %804 = vmatprep.subr.bf16.mxu1 %v3482_v57  ;;  %s4518_s20 = smov 80   ;;  %s4516_s26 = smov 24  }
  0x20   : > { %690 = vmatpush1.bf16.msra.mxu0 %v3467_v8  ;;  %v3932_v8 = vld [vmem:[%s4502_s7 + $0x8] sm:$0xff]   ;;  %s4545_s23 = smov 48  }
  0x21   : > { %v536_v6 = vcombine.high %v534_v5, %v534_v5  ;;  %v539_v7 = vsel %vm538_vm0, %v534_v5, 0.0  ;;  %691 = vmatprep.subr.bf16.mxu0 %v3673_v0 }
  0x22   : > { %805 = vmatpush1.bf16.msra.mxu1 %v3484_v58 }
  0x23   : > { %v541_v9 = vsel %vm540_vm1, %v536_v6, 0.0  ;;  %806 = vmatprep.subr.bf16.mxu1 %v3485_v59  ;;  %v3924_v6 = vld [vmem:[%s4502_s7] sm:$0xff]  }
  0x24   : > { %v542_v10 = vadd.f32 %v541_v9, %v539_v7  ;;  %692 = vmatpush1.bf16.msra.mxu0 %v3468_v11  ;;  %v3675_v7 = vmov 0.0   ;;  %v3490_v9 = vld [vmem:[%s4502_s7 + $0x10] ss:$0 sps:$4 sm:$0xff]  }
  0x25   : > { %693 = vmatprep.subr.bf16.mxu0 %v3673_v0 }
  0x26   : > { %543 = vadd.xlane.f32.xlu0 %v542_v10  ;;  %807 = vmatpush1.bf16.msra.mxu1 %v3487_v60  ;;  %v3941_v10 = vsel %vm538_vm0, %v3490_v9, 0 }
  0x27   : > { %3225 = vmatprep.subr.bf16.mxu1 %v3675_v7 }
  0x28   : > { %694 = vmatpush1.bf16.msra.mxu0 %v3469_v12 }
  0x29   : > { %695 = vmatprep.subr.bf16.mxu0 %v3673_v0 }
  0x2c   : > { %696 = vmatpush1.bf16.msra.mxu0 %v3470_v13 }
  0x2d   : > { %697 = vmatprep.subr.bf16.mxu0 %v3673_v0 }
  0x30   : > { %698 = vmatpush1.bf16.msra.mxu0 %v3471_v14 }
  0x31   : > { %699 = vmatprep.subr.bf16.mxu0 %v3673_v0 }
  0x34   : > { %700 = vmatpush1.bf16.msra.mxu0 %v3472_v15 }
  0x35   : > { %701 = vmatprep.subr.bf16.mxu0 %v3673_v0 }
  0x38   : > { %702 = vmatpush1.bf16.msra.mxu0 %v3473_v16 }
  0x39   : > { %703 = vmatprep.subr.bf16.mxu0 %v3673_v0 }
  0x3c   : > { %704 = vmatpush1.bf16.msra.mxu0 %v3474_v17 }
  0x3d   : > { %705 = vmatprep.subr.bf16.mxu0 %v3673_v0 }
  0x40   : > { %706 = vmatpush1.bf16.msra.mxu0 %v3475_v18  ;;  %v3002_v18 = vld [vmem:[%s4505_s10] ss:$0 sm:$0xff] }
  0x41   : > { %3215 = vmatprep.subr.bf16.mxu0 %v3675_v7 }
  0xb3   : > { %v544_v19 = vpop.xlane.xlu0 %543 }
  0xb4   : > { %v546_v21 = vmul.f32 0.0052083335, %v544_v19 }
  0xb6   : > { %v547_v22 = vadd.f32 1e-06, %v546_v21 }
  0xb8   : > { %3555 = vrsqrt.f32 %v547_v22 }
  0xc2   : > { %v3556_v33 = vpop.eup %3555 }
  0xc3   : > { %v556_v34 = vrot.slane %v3556_v33, %v555_v30 }
  0xc5   : > { %v558_v36 = vmul.f32 %v556_v34, %v532_v3 }
  0xc7   : > { %v570_v37 = vmul.f32 %v568_v35, %v558_v36  ;;  %v3984_v36 = vld [vmem:[%s4501_s6] sm:$0xff] }
  0xc9   : > { %v596_v38 = vcombine.high %v570_v37, %v570_v37  ;;  %v598_v40 = vpack.c.bf16 %v570_v37, %v570_v37 }
  0xcb   : > { %v599_v39 = vpack.c.bf16 %v596_v38, %v596_v38 }
  0xcd   : > { %2991 = vmatprep.mubr.msk.bf16.mxu0 %vm679_vm2, %v599_v39 }
  0xce   : > { %716 = vmatmul.mubr.bf16.vlgmr.msra.gmra.mrb[0].mxu0 %v598_v40 }
  0xcf   : > { %3216 = vmatpush3.bf16.msra.mxu0 %v3924_v6  ;;  %3221 = vmatprep.mubr.msk.bf16.mxu0 %vm3676_vm5, %v3675_v7 }
  0xd0   : > { %3217 = vmatprep.subr.bf16.mxu0 %v3675_v7 }
  0xd3   : > { %3218 = vmatpush3.bf16.msra.mxu0 %v3932_v8 }
  0xd4   : > { %3219 = vmatprep.subr.bf16.mxu0 %v3675_v7 }
  0xd7   : > { %3220 = vmatpush3.bf16.msra.mxu0 %v3941_v10 }
  0xd8   : > { %3245 = vmatprep.subr.bf16.mxu0 %v3675_v7 }
 0x1a1   : > { %v717_v42 = vpop.f32.mrb[0].mxu0 }
 0x1a2   : > { %v718_v43 = vadd.f32 %v2978_v41, %v717_v42  ;;  %v719_v44 = vpop.f32.mrb[1].mxu0 }
 0x1a3   : > { %v720_v46 = vpop.f32.mrb[2].mxu0 }
 0x1a4   : > { %v725_v47 = vrot.slane %v718_v43, 7  ;;  %v721_v48 = vpop.f32.mrb[3].mxu0 }
 0x1a6   : > { %v728_v49 = vsel %vm727_vm3, %v723_v45, %v725_v47 }
 0x1a7   : > { %v3887_v50 = vsel %vm729_vm4, %v728_v49, 0.0 }
 0x1a8   : > { %v732_v51 = vmul.f32 %v3887_v50, %v3887_v50 }
 0x1aa   : > { %v733_v52 = vsel %vm679_vm2, %v732_v51, 0.0 }
 0x1ab   : > { %734 = vadd.xlane.f32.xlu0 %v733_v52 }
 0x238   : > { %v735_v61 = vpop.xlane.xlu0 %734 }
 0x239   : > { %v737_v62 = vmul.f32 0.015625, %v735_v61 }
 0x23b   : > { %v738_v63 = vadd.f32 1e-06, %v737_v62 }
 0x23d   : > { %3557 = vrsqrt.f32 %v738_v63 }
 0x247   : > { %v3558_v1 = vpop.eup %3557 }
 0x248   : > { %v740_v3 = vmul.f32 %v3558_v1, %v3887_v50 }
 0x24a   : > { %v747_v4 = vmul.f32 %v2992_v2, %v740_v3 }
 0x24c   : > { %v756_v5 = vpack.c.bf16 %v747_v4, %v747_v4 }
 0x24e   : > { %3001 = vmatmul.mubr.msk.bf16.vlgmr.msra.gmra.mrb[0].mxu1 %vm679_vm2, %v756_v5 }
 0x24f   : > { %3229 = vmatprep.mubr.msk.bf16.mxu1 %vm3676_vm5, %v3675_v7  ;;  %3226 = vmatpush3.bf16.msra.mxu1 %v3491_v26 }
 0x250   : > { %3227 = vmatprep.subr.bf16.mxu1 %v3675_v7 }
 0x253   : > { %3228 = vmatpush3.bf16.msra.mxu1 %v3492_v27 }
 0x254   : > { %3233 = vmatprep.subr.bf16.mxu1 %v3675_v7 }
 0x321   : > { %v3949_v11 = vpop.f32.mrb[0].mxu1 }
 0x322   : > { %v836_v12 = vpop.f32.mrb[1].mxu1  ;;  %v871_v13 = vpack.c.bf16 %v3949_v11, %v3949_v11  ;;  %v842_v14 = vmul.f32 %v3949_v11, %v3949_v11 }
 0x323   : > { %v838_v15 = vpop.f32.mrb[2].mxu1  ;;  %v872_v17 = vpack.c.bf16 %v836_v12, %v836_v12 }
 0x324   : > { %875 = vrot.lane.b32.xlu0 %v871_v13, %s4530_s18  ;;  %844 = vrot.lane.b32.xlu1 %v842_v14, %s4528_s19  ;;  %v839_v16 = vpop.f32.mrb[3].mxu1 }
 0x328   : > { %877 = vrot.lane.b32.xlu0 %v872_v17, %s4530_s18 }
 0x32c   : > { %861 = vrot.lane.b32.xlu0 %v3002_v18, %s4528_s19 }
 0x396   : > { %v876_v19 = vpop.permute.xlu0 %875  ;;  %v845_v21 = vpop.permute.xlu1 %844 }
 0x397   : > { %v848_v22 = vsel %vm847_vm6, %v845_v21, 0.0 }
 0x398   : > { %849 = vadd.xlane.f32.xlu1 %v848_v22 }
 0x39a   : > { %v878_v23 = vpop.permute.xlu0 %877 }
 0x39b   : > { %v880_v24 = vsel %vm847_vm6, %v876_v19, %v878_v23 }
 0x39c   : > { %3222 = vmatmul.mubr.msk.bf16.vlgmr.msra.gmra.mrb[4].mxu0 %vm896_vm7, %v880_v24 }
 0x39d   : > { %3247 = vmatprep.mubr.msk.bf16.mxu0 %vm3676_vm5, %v3675_v7 }
 0x39e   : > { %v862_v32 = vpop.permute.xlu0 %861 }
 0x3a9   : > { %866 = vrot.lane.b32.xlu1 %v521_v25, %s4522_s30 }
 0x425   : > { %v850_v28 = vpop.xlane.xlu1 %849 }
 0x426   : > { %v852_v29 = vmul.f32 0.03125, %v850_v28 }
 0x428   : > { %v853_v30 = vadd.f32 1e-06, %v852_v29 }
 0x429   : > { %v3991_v43 = vpop.permute.xlu1 %866 }
 0x42a   : > { %3559 = vrsqrt.f32 %v853_v30  ;;  %v870_v44 = vmul.f32 %v3991_v43, %v836_v12  ;;  %v869_v47 = vmul.f32 %v3991_v43, %v3949_v11  ;;  %v529_v30 = vand.u32 127, %v528_v20 }
 0x42c   : > { %vm530_vm10 = vcmp.lt.s32.totalorder %v529_v30, 5 }
 0x434   : > { %v3560_v31 = vpop.eup %3559 }
 0x435   : > { %v855_v33 = vmul.f32 %v3560_v31, %v3949_v11 }
 0x437   : > { %v864_v34 = vmul.f32 %v862_v32, %v855_v33  ;;  %v3686_v32 = vmov -1e+30  }
 0x438   : > { %v4046_v33 = vsel %vm530_vm10, 0.0, %v3686_v32 }
 0x439   : > { %v954_v35 = vpack.c.bf16 %v864_v34, %v864_v34 }
 0x43b   : > { %956 = vrot.lane.b32.xlu0 %v954_v35, %s4528_s19 }
 0x46f   : > { %v937_v37 = vpop.f32.mrb[4].mxu0 }
 0x470   : > { %v943_v38 = vmul.f32 %v937_v37, %v3984_v36  ;;  %v3223_v39 = vpop.f32.mrb[5].mxu0 }
 0x471   : > { %v940_v40 = vpop.f32.mrb[6].mxu0 }
 0x472   : > { %v3224_v41 = vpop.f32.mrb[7].mxu0  ;;  %945 = vrot.lane.b32.xlu0 %v943_v38, %s4522_s30 }
 0x4ad   : > { %v957_v42 = vpop.permute.xlu0 %956 }
 0x4ae   : > { %3230 = vmatmul.mubr.msk.bf16.vlgmr.msra.gmra.mrb[4].mxu1 %vm847_vm6, %v957_v42 }
 0x4af   : > { %3235 = vmatprep.mubr.msk.bf16.mxu1 %vm3676_vm5, %v3675_v7 }
 0x4e4   : > { %v946_v45 = vpop.permute.xlu0 %945 }
 0x4e5   : > { %v949_v46 = vadd.f32 %v946_v45, %v870_v44  ;;  %v948_v48 = vadd.f32 %v946_v45, %v869_v47 }
 0x4e7   : > { %1042 = vrot.lane.b32.xlu0 %v949_v46, %s4526_s27 }
 0x4eb   : > { %1014 = vrot.lane.b32.xlu0 %v948_v48, %s4524_s17 }
 0x559   : > { %v1043_v49 = vpop.permute.xlu0 %1042 }
 0x55d   : > { %v1015_v58 = vpop.permute.xlu0 %1014 }
 0x55e   : > { %v1018_v59 = vsel %vm1017_vm8, %v3949_v11, %v1015_v58 }
 0x55f   : > { %v1059_v60 = vpack.c.bf16 %v1018_v59, %v1018_v59 }
 0x581   : > { %v1007_v51 = vpop.f32.mrb[4].mxu1 }
 0x582   : > { %1051 = vrot.lane.b32.xlu1 %v1007_v51, %s4522_s30  ;;  %1047 = vrot.lane.b32.xlu0 %v1007_v51, %s4520_s28  ;;  %v3231_v52 = vpop.f32.mrb[5].mxu1  ;;  %v1045_v53 = vsel %vm1017_vm8, %v1007_v51, %v1043_v49  ;;  %v1301_v61 = vpack.c.bf16 %v1007_v51, %v1007_v51 }
 0x583   : > { %v1010_v54 = vpop.f32.mrb[6].mxu1  ;;  %v1063_v55 = vpack.c.bf16 %v1045_v53, %v1045_v53 }
 0x584   : > { %v3232_v56 = vpop.f32.mrb[7].mxu1 }
 0x585   : > { %v1072_v57 = vsel %vm1067_vm9, %v1063_v55, 0 }
 0x586   : > { %1023 = vrot.lane.b32.xlu1 %v948_v48, %s4517_s29  ;;  %1020 = vrot.lane.b32.xlu0 %v3949_v11, %s4520_s28  ;;  %s4540_s29 = smov 32   ;;  %s4543_s28 = smov 16  }
 0x587   : > { %3234 = vmatpush3.bf16.xpose.msra.mxu1 %v1072_v57 }
 0x588   : > { %3239 = vmatprep.subr.bf16.mxu1 %v3675_v7 }
 0x58a   : > { %1027 = vrot.lane.b32.xlu1 %v3949_v11, %s4522_s30  ;;  %1055 = vrot.lane.b32.xlu0 %v1007_v51, %s4518_s20  ;;  %s4542_s30 = smov 96  }
 0x58e   : > { %3236 = vmatmul.mubr.msk.bf16.vlgmr.msra.gmra.mrb[8].mxu1 %vm1067_vm9, %v1059_v60  ;;  %1034 = vrot.lane.b32.xlu1 %v3949_v11, %s4518_s20  ;;  %s4541_s20 = smov 64  }
 0x58f   : > { %1030 = vrot.lane.b32.xlu0 %v948_v48, %s4530_s18  ;;  %3241 = vmatprep.mubr.msk.bf16.mxu1 %vm3676_vm5, %v3675_v7 }
 0x592   : > { %1306 = vrot.lane.b32.xlu1 %v1301_v61, %s4528_s19 }
 0x593   : > { %1037 = vrot.lane.b32.xlu0 %v948_v48, %s4516_s26  ;;  %s4544_s26 = smov 112  }
 0x5f4   : > { %v1052_v62 = vpop.permute.xlu1 %1051  ;;  %v4019_v63 = vpop.permute.xlu0 %1047 }
 0x5f5   : > { %v1054_v1 = vsel %vm1017_vm8, %v1052_v62, %v1043_v49  ;;  %v1050_v2 = vsel %vm1017_vm8, %v4019_v63, %v1043_v49  ;;  %v1303_v41 = vpack.c.bf16 %v1052_v62, %v1052_v62 }
 0x5f6   : > { %v1065_v3 = vpack.c.bf16 %v1054_v1, %v1054_v1  ;;  %v1064_v4 = vpack.c.bf16 %v1050_v2, %v1050_v2 }
 0x5f8   : > { %v1024_v5 = vpop.permute.xlu1 %1023  ;;  %v1021_v9 = vpop.permute.xlu0 %1020  ;;  %v1118_v11 = vsel %vm1067_vm9, %v1064_v4, 0  ;;  %v1164_v12 = vsel %vm1067_vm9, %v1065_v3, 0 }
 0x5f9   : > { %3240 = vmatpush3.bf16.xpose.msra.mxu1 %v1118_v11  ;;  %3246 = vmatpush3.bf16.xpose.msra.mxu0 %v1164_v12  ;;  %v1026_v13 = vsel %vm1017_vm8, %v1021_v9, %v1024_v5  ;;  %v1302_v5 = vpack.c.bf16 %v4019_v63, %v4019_v63 }
 0x5fa   : > { %3251 = vmatprep.subr.bf16.mxu1 %v3675_v7  ;;  %3257 = vmatprep.subr.bf16.mxu0 %v3675_v7  ;;  %v1060_v17 = vpack.c.bf16 %v1026_v13, %v1026_v13 }
 0x5fc   : > { %v1028_v14 = vpop.permute.xlu1 %1027  ;;  %v1056_v15 = vpop.permute.xlu0 %1055 }
 0x5fd   : > { %v1058_v16 = vsel %vm1017_vm8, %v1056_v15, %v1043_v49  ;;  %v1304_v42 = vpack.c.bf16 %v1056_v15, %v1056_v15 }
 0x5fe   : > { %v1066_v18 = vpack.c.bf16 %v1058_v16, %v1058_v16 }
 0x600   : > { %v1035_v19 = vpop.permute.xlu1 %1034  ;;  %3242 = vmatmul.mubr.msk.bf16.vlgmr.msra.gmra.mrb[12].mxu1 %vm1067_vm9, %v1060_v17  ;;  %v1210_v21 = vsel %vm1067_vm9, %v1066_v18, 0 }
 0x601   : > { %v1031_v22 = vpop.permute.xlu0 %1030  ;;  %3252 = vmatpush3.bf16.xpose.msra.mxu1 %v1210_v21  ;;  %3253 = vmatprep.mubr.msk.bf16.mxu1 %vm3676_vm5, %v3675_v7 }
 0x602   : > { %v1033_v23 = vsel %vm1017_vm8, %v1028_v14, %v1031_v22  ;;  %3263 = vmatprep.subr.bf16.mxu1 %v3675_v7 }
 0x603   : > { %v1061_v24 = vpack.c.bf16 %v1033_v23, %v1033_v23 }
 0x604   : > { %v1307_v25 = vpop.permute.xlu1 %1306 }
 0x605   : > { %3248 = vmatmul.mubr.msk.bf16.vlgmr.msra.gmra.mrb[8].mxu0 %vm1067_vm9, %v1061_v24  ;;  %v1038_v26 = vpop.permute.xlu0 %1037  ;;  %v1312_v27 = vsel %vm538_vm0, %v1307_v25, 0 }
 0x606   : > { %v1040_v28 = vsel %vm1017_vm8, %v1035_v19, %v1038_v26  ;;  %3258 = vmatpush3.bf16.msra.mxu0 %v1312_v27  ;;  %3259 = vmatprep.mubr.msk.bf16.mxu0 %vm3676_vm5, %v3675_v7 }
 0x607   : > { %v1062_v29 = vpack.c.bf16 %v1040_v28, %v1040_v28  ;;  %3269 = vmatprep.subr.bf16.mxu0 %v3675_v7 }
 0x609   : > { %3254 = vmatmul.mubr.msk.bf16.vlgmr.msra.gmra.mrb[16].mxu1 %vm1067_vm9, %v1062_v29 }
 0x60a   : > { %3265 = vmatprep.mubr.msk.bf16.mxu1 %vm3676_vm5, %v3675_v7 }
 0x661   : > { %v1108_v31 = vpop.f32.mrb[8].mxu1 }
 0x662   : > { %v1252_v34 = vmul.f32 0.20412415, %v1108_v31  ;;  %v3237_v35 = vpop.f32.mrb[9].mxu1 }
 0x663   : > { %v1111_v37 = vpop.f32.mrb[10].mxu1 }
 0x664   : > { %v3238_v38 = vpop.f32.mrb[11].mxu1  ;;  %v1256_v39 = vadd.f32 %v1252_v34, %v4046_v33 }
 0x666   : > { %v1261_v40 = vsel %vm1260_vm11, %v1256_v39, -inf }
 0x667   : > { %1262 = vmax.xlane.f32.xlu1 %v1261_v40  ;;  %v3493_v40 = vld [vmem:[%s4507_s12] sm:$0xff]  }
 0x678   : > { %1404 = vrot.lane.b32.xlu1 %v1303_v41, %s4528_s19 }
 0x67c   : > { %1453 = vrot.lane.b32.xlu1 %v1304_v42, %s4528_s19 }
 0x6d3   : > { %v1154_v20 = vpop.f32.mrb[12].mxu1 }
 0x6d4   : > { %v1253_v44 = vmul.f32 0.20412415, %v1154_v20  ;;  %v3243_v45 = vpop.f32.mrb[13].mxu1 }
 0x6d5   : > { %v1157_v46 = vpop.f32.mrb[14].mxu1 }
 0x6d6   : > { %v3244_v47 = vpop.f32.mrb[15].mxu1  ;;  %v1257_v48 = vadd.f32 %v1253_v44, %v4046_v33 }
 0x6d7   : > { %v3494_v47 = vld [vmem:[%s4507_s12 + $0x8] sm:$0xff]  }
 0x6d8   : > { %v1200_v49 = vpop.f32.mrb[8].mxu0  ;;  %v1264_v51 = vsel %vm1260_vm11, %v1257_v48, -inf }
 0x6d9   : > { %v1254_v52 = vmul.f32 0.20412415, %v1200_v49  ;;  %v3249_v53 = vpop.f32.mrb[9].mxu0  ;;  %1265 = vmax.xlane.f32.xlu0 %v1264_v51  ;;  %v3496_v51 = vld [vmem:[%s4507_s12 + $0x18] sm:$0xff]  }
 0x6da   : > { %v1203_v54 = vpop.f32.mrb[10].mxu0 }
 0x6db   : > { %v3250_v55 = vpop.f32.mrb[11].mxu0  ;;  %v1258_v56 = vadd.f32 %v1254_v52, %v4046_v33 }
 0x6dc   : > { %v1246_v57 = vpop.f32.mrb[16].mxu1 }
 0x6dd   : > { %v1255_v58 = vmul.f32 0.20412415, %v1246_v57  ;;  %v3255_v59 = vpop.f32.mrb[17].mxu1  ;;  %v1267_v60 = vsel %vm1260_vm11, %v1258_v56, -inf }
 0x6de   : > { %1268 = vmax.xlane.f32.xlu0 %v1267_v60  ;;  %v1249_v61 = vpop.f32.mrb[18].mxu1 }
 0x6df   : > { %v3256_v62 = vpop.f32.mrb[19].mxu1  ;;  %v1259_v1 = vadd.f32 %v1255_v58, %v4046_v33 }
 0x6e1   : > { %v1270_v2 = vsel %vm1260_vm11, %v1259_v1, -inf }
 0x6e2   : > { %1271 = vmax.xlane.f32.xlu0 %v1270_v2 }
 0x6f4   : > { %v1263_v3 = vpop.xlane.xlu1 %1262 }
 0x6f5   : > { %v1273_v4 = vsub.f32 %v1256_v39, %v1263_v3 }
 0x6f7   : > { %v1277_v9 = vmul.f32 1.442695, %v1273_v4 }
 0x6f8   : > { %1355 = vrot.lane.b32.xlu0 %v1302_v5, %s4528_s19  ;;  %v1405_v12 = vpop.permute.xlu1 %1404  ;;  %s4547_s19 = smov 40  }
 0x6f9   : > { %3561 = vpow2.f32 %v1277_v9  ;;  %v1410_v14 = vsel %vm538_vm0, %v1405_v12, 0 }
 0x6fc   : > { %v1454_v27 = vpop.permute.xlu1 %1453 }
 0x6fd   : > { %v1459_v30 = vsel %vm538_vm0, %v1454_v27, 0 }
 0x703   : > { %v3562_v11 = vpop.eup %3561 }
 0x704   : > { %v1297_v13 = vpack.c.bf16 %v3562_v11, %v3562_v11  ;;  %v1285_v39 = vsel %vm1260_vm11, %v3562_v11, 0.0 }
 0x706   : > { %3260 = vmatmul.mubr.msk.bf16.vlgmr.msra.gmra.mrb[12].mxu0 %vm1260_vm11, %v1297_v13 }
 0x707   : > { %3270 = vmatpush3.bf16.msra.mxu0 %v1410_v14  ;;  %3271 = vmatprep.mubr.msk.bf16.mxu0 %vm3676_vm5, %v3675_v7 }
 0x708   : > { %3281 = vmatprep.subr.bf16.mxu0 %v3675_v7 }
 0x766   : > { %v1266_v15 = vpop.xlane.xlu0 %1265 }
 0x767   : > { %v1274_v16 = vsub.f32 %v1257_v48, %v1266_v15  ;;  %v3495_v48 = vld [vmem:[%s4507_s12 + $0x10] sm:$0xff]  }
 0x769   : > { %v1279_v63 = vmul.f32 1.442695, %v1274_v16 }
 0x76b   : > { %3563 = vpow2.f32 %v1279_v63  ;;  %v1269_v17 = vpop.xlane.xlu0 %1268 }
 0x76c   : > { %v1275_v18 = vsub.f32 %v1258_v56, %v1269_v17 }
 0x76e   : > { %v1281_v19 = vmul.f32 1.442695, %v1275_v18 }
 0x76f   : > { %v1272_v21 = vpop.xlane.xlu0 %1271 }
 0x770   : > { %3565 = vpow2.f32 %v1281_v19  ;;  %v1276_v22 = vsub.f32 %v1259_v1, %v1272_v21 }
 0x772   : > { %v1283_v23 = vmul.f32 1.442695, %v1276_v22 }
 0x773   : > { %v1356_v24 = vpop.permute.xlu0 %1355 }
 0x774   : > { %3567 = vpow2.f32 %v1283_v23  ;;  %v1361_v25 = vsel %vm538_vm0, %v1356_v24, 0 }
 0x775   : > { %v3564_v26 = vpop.eup %3563  ;;  %3264 = vmatpush3.bf16.msra.mxu1 %v1361_v25 }
 0x776   : > { %v1288_v28 = vsel %vm1260_vm11, %v3564_v26, 0.0  ;;  %3275 = vmatprep.subr.bf16.mxu1 %v3675_v7  ;;  %v1298_v29 = vpack.c.bf16 %v3564_v26, %v3564_v26 }
 0x777   : > { %1289 = vadd.xlane.f32.xlu1 %v1288_v28 }
 0x778   : > { %3266 = vmatmul.mubr.msk.bf16.vlgmr.msra.gmra.mrb[20].mxu1 %vm1260_vm11, %v1298_v29  ;;  %v3499_v29 = vld [vmem:[%s4509_s14 + $0x4] ss:$8 sps:$4 sm:$0xff]  }
 0x779   : > { %3276 = vmatpush3.bf16.msra.mxu1 %v1459_v30  ;;  %3277 = vmatprep.mubr.msk.bf16.mxu1 %vm3676_vm5, %v3675_v7  ;;  %v3497_v30 = vld [vmem:[%s4509_s14] ss:$8 sps:$4 sm:$0xff]  }
 0x77a   : > { %v3566_v31 = vpop.eup %3565  ;;  %1670 = vmatprep.subr.bf16.mxu1 %v3499_v29 }
 0x77b   : > { %v1291_v32 = vsel %vm1260_vm11, %v3566_v31, 0.0  ;;  %v1299_v34 = vpack.c.bf16 %v3566_v31, %v3566_v31  ;;  %v3500_v31 = vld [vmem:[%s4509_s14 + $0x10] ss:$8 sps:$4 sm:$0xff]  }
 0x77c   : > { %1292 = vadd.xlane.f32.xlu0 %v1291_v32  ;;  %v3505_v32 = vld [vmem:[%s4509_s14 + $0x24] ss:$8 sps:$4 sm:$0xff]  }
 0x77d   : > { %3272 = vmatmul.mubr.msk.bf16.vlgmr.msra.gmra.mrb[16].mxu0 %vm1260_vm11, %v1299_v34  ;;  %v3503_v34 = vld [vmem:[%s4509_s14 + $0x20] ss:$8 sps:$4 sm:$0xff]  }
 0x77e   : > { %v3568_v35 = vpop.eup %3567  ;;  %3289 = vmatprep.mubr.msk.bf16.mxu0 %vm3676_vm5, %v3675_v7  ;;  %3282 = vmatpush3.bf16.msra.mxu0 %v3493_v40 }
 0x77f   : > { %v1294_v37 = vsel %vm1260_vm11, %v3568_v35, 0.0  ;;  %v1300_v38 = vpack.c.bf16 %v3568_v35, %v3568_v35  ;;  %3283 = vmatprep.subr.bf16.mxu0 %v3675_v7  ;;  %v3506_v35 = vld [vmem:[%s4509_s14 + $0x30] ss:$8 sps:$4 sm:$0xff]  }
 0x780   : > { %1295 = vadd.xlane.f32.xlu0 %v1294_v37  ;;  %v3508_v37 = vld [vmem:[%s4509_s14 + $0x34] ss:$8 sps:$4 sm:$0xff]  }
 0x781   : > { %3278 = vmatmul.mubr.msk.bf16.vlgmr.msra.gmra.mrb[24].mxu1 %vm1260_vm11, %v1300_v38 }
 0x782   : > { %1702 = vmatprep.mubr.bf16.mxu1 %v3673_v0  ;;  %3284 = vmatpush3.bf16.msra.mxu0 %v3494_v47  ;;  %v3510_v47 = vld [vmem:[%s4510_s15 + $0x8] sm:$0xff]  }
 0x783   : > { %3285 = vmatprep.subr.bf16.mxu0 %v3675_v7  ;;  %1671 = vmatpush1.bf16.msra.mxu1 %v3497_v30 }
 0x784   : > { %1286 = vadd.xlane.f32.xlu0 %v1285_v39 }
 0x786   : > { %3286 = vmatpush3.bf16.msra.mxu0 %v3495_v48  ;;  %v3511_v48 = vld [vmem:[%s4510_s15 + $0x10] sm:$0xff]  }
 0x787   : > { %3287 = vmatprep.subr.bf16.mxu0 %v3675_v7 }
 0x78a   : > { %3288 = vmatpush3.bf16.msra.mxu0 %v3496_v51  ;;  %v3513_v51 = vld [vmem:[%s4510_s15 + $0x20] sm:$0xff]  }
 0x78b   : > { %3293 = vmatprep.subr.bf16.mxu0 %v3675_v7 }
 0x7d9   : > { %v1348_v41 = vpop.f32.mrb[12].mxu0 }
 0x7da   : > { %v3261_v42 = vpop.f32.mrb[13].mxu0 }
 0x7db   : > { %v1351_v20 = vpop.f32.mrb[14].mxu0  ;;  %v3023_v42 = vld [vmem:[%s4508_s13] ss:$0 sm:$0xff] }
 0x7dc   : > { %v3262_v44 = vpop.f32.mrb[15].mxu0 }
 0x804   : > { %v1290_v45 = vpop.xlane.xlu1 %1289 }
 0x805   : > { %3569 = vrcp.f32 %v1290_v45 }
 0x809   : > { %v1293_v46 = vpop.xlane.xlu0 %1292 }
 0x80a   : > { %3571 = vrcp.f32 %v1293_v46  ;;  %v3509_v46 = vld [vmem:[%s4510_s15] sm:$0xff]  }
 0x80d   : > { %v1296_v49 = vpop.xlane.xlu0 %1295 }
 0x80e   : > { %3573 = vrcp.f32 %v1296_v49  ;;  %v3512_v49 = vld [vmem:[%s4510_s15 + $0x18] sm:$0xff]  }
 0x80f   : > { %v3570_v52 = vpop.eup %3569 }
 0x811   : > { %v1287_v12 = vpop.xlane.xlu0 %1286 }
 0x812   : > { %3575 = vrcp.f32 %v1287_v12 }
 0x814   : > { %v3572_v58 = vpop.eup %3571 }
 0x818   : > { %v3574_v2 = vpop.eup %3573 }
 0x81c   : > { %v3576_v13 = vpop.eup %3575 }
 0x81d   : > { %v1505_v15 = vmul.f32 %v3576_v13, %v1348_v41 }
 0x84b   : > { %v1397_v53 = vpop.f32.mrb[20].mxu1 }
 0x84c   : > { %v1506_v54 = vmul.f32 %v3570_v52, %v1397_v53  ;;  %v3267_v55 = vpop.f32.mrb[21].mxu1  ;;  %v3514_v52 = vld [vmem:[%s4510_s15 + $0x28] sm:$0xff]   ;;  %v3515_v53 = vld [vmem:[%s4510_s15 + $0x30] sm:$0xff]  }
 0x84d   : > { %v1400_v56 = vpop.f32.mrb[22].mxu1 }
 0x84e   : > { %1510 = vrot.lane.b32.xlu1 %v1506_v54, %s4526_s27  ;;  %v3268_v57 = vpop.f32.mrb[23].mxu1  ;;  %v3516_v54 = vld [vmem:[%s4510_s15 + $0x38] sm:$0xff]   ;;  %s4548_s27 = smov 24  }
 0x850   : > { %v1446_v59 = vpop.f32.mrb[16].mxu0 }
 0x851   : > { %v1507_v60 = vmul.f32 %v3572_v58, %v1446_v59  ;;  %v3273_v61 = vpop.f32.mrb[17].mxu0 }
 0x852   : > { %v1449_v62 = vpop.f32.mrb[18].mxu0 }
 0x853   : > { %v3274_v1 = vpop.f32.mrb[19].mxu0  ;;  %1514 = vrot.lane.b32.xlu0 %v1507_v60, %s4530_s18  ;;  %s4546_s18 = smov 80  }
 0x854   : > { %v1495_v3 = vpop.f32.mrb[24].mxu1 }
 0x855   : > { %v1508_v4 = vmul.f32 %v3574_v2, %v1495_v3  ;;  %v3279_v5 = vpop.f32.mrb[25].mxu1 }
 0x856   : > { %v1498_v9 = vpop.f32.mrb[26].mxu1 }
 0x857   : > { %1518 = vrot.lane.b32.xlu1 %v1508_v4, %s4524_s17  ;;  %v3280_v11 = vpop.f32.mrb[27].mxu1  ;;  %s3687_s17 = smov [#allocation2]  }
 0x8c0   : > { %v1511_v14 = vpop.permute.xlu1 %1510 }
 0x8c1   : > { %v1521_v63 = vsel %vm1017_vm8, %v1505_v15, %v1511_v14  ;;  %v3519_v15 = vld [vmem:[%s4504_s9 + $0x44] ss:$8 sps:$4 sm:$0xff]  }
 0x8c5   : > { %v1515_v16 = vpop.permute.xlu0 %1514 }
 0x8c6   : > { %v1522_v17 = vsel %vm847_vm6, %v1521_v63, %v1515_v16  ;;  %v3517_v16 = vld [vmem:[%s4504_s9 + $0x40] ss:$8 sps:$4 sm:$0xff]   ;;  %v3522_v63 = vld [vmem:[%s4504_s9 + $0x54] ss:$8 sps:$4 sm:$0xff]  }
 0x8c9   : > { %v1519_v18 = vpop.permute.xlu1 %1518 }
 0x8ca   : > { %v1524_v19 = vsel %vm1523_vm12, %v1522_v17, %v1519_v18  ;;  %v3520_v17 = vld [vmem:[%s4504_s9 + $0x50] ss:$8 sps:$4 sm:$0xff]   ;;  %v3525_v18 = vld [vmem:[%s4504_s9 + $0x64] ss:$8 sps:$4 sm:$0xff]  }
 0x8cb   : > { %v1533_v21 = vpack.c.bf16 %v1524_v19, %v1524_v19  ;;  %v3523_v19 = vld [vmem:[%s4504_s9 + $0x60] ss:$8 sps:$4 sm:$0xff]  }
 0x8cd   : > { %3290 = vmatmul.mubr.msk.bf16.vlgmr.msra.gmra.mrb[20].mxu0 %vm679_vm2, %v1533_v21  ;;  %v3526_v21 = vld [vmem:[%s4504_s9 + $0x70] ss:$8 sps:$4 sm:$0xff]  }
 0x8ce   : > { %3309 = vmatprep.mubr.msk.bf16.mxu0 %vm3676_vm5, %v3675_v7  ;;  %3294 = vmatpush3.bf16.msra.mxu0 %v3509_v46 }
 0x8cf   : > { %3295 = vmatprep.subr.bf16.mxu0 %v3675_v7 }
 0x8d2   : > { %3296 = vmatpush3.bf16.msra.mxu0 %v3510_v47 }
 0x8d3   : > { %3297 = vmatprep.subr.bf16.mxu0 %v3675_v7 }
 0x8d6   : > { %3298 = vmatpush3.bf16.msra.mxu0 %v3511_v48 }
 0x8d7   : > { %3299 = vmatprep.subr.bf16.mxu0 %v3675_v7 }
 0x8da   : > { %3300 = vmatpush3.bf16.msra.mxu0 %v3512_v49 }
 0x8db   : > { %3301 = vmatprep.subr.bf16.mxu0 %v3675_v7 }
 0x8de   : > { %3302 = vmatpush3.bf16.msra.mxu0 %v3513_v51 }
 0x8df   : > { %3303 = vmatprep.subr.bf16.mxu0 %v3675_v7 }
 0x8e2   : > { %3304 = vmatpush3.bf16.msra.mxu0 %v3514_v52 }
 0x8e3   : > { %3305 = vmatprep.subr.bf16.mxu0 %v3675_v7 }
 0x8e6   : > { %3306 = vmatpush3.bf16.msra.mxu0 %v3515_v53 }
 0x8e7   : > { %3307 = vmatprep.subr.bf16.mxu0 %v3675_v7 }
 0x8ea   : > { %3308 = vmatpush3.bf16.msra.mxu0 %v3516_v54 }
 0x8eb   : > { %3323 = vmatprep.subr.bf16.mxu0 %v3675_v7 }
 0x9a0   : > { %v1595_v22 = vpop.f32.mrb[20].mxu0 }
 0x9a1   : > { %v4107_v23 = vadd.f32 %v1595_v22, %v3887_v50  ;;  %v3291_v24 = vpop.f32.mrb[21].mxu0  ;;  %v3502_v50 = vld [vmem:[%s4509_s14 + $0x14] ss:$8 sps:$4 sm:$0xff]  }
 0x9a2   : > { %v1598_v25 = vpop.f32.mrb[22].mxu0  ;;  %1672 = vmatprep.subr.bf16.mxu1 %v3502_v50  ;;  %v3528_v22 = vld [vmem:[%s4504_s9 + $0x74] ss:$8 sps:$4 sm:$0xff]  }
 0x9a3   : > { %v3292_v26 = vpop.f32.mrb[23].mxu0  ;;  %v1603_v27 = vmul.f32 %v4107_v23, %v4107_v23  ;;  %1673 = vmatpush1.bf16.msra.mxu1 %v3500_v31 }
 0x9a4   : > { %1674 = vmatprep.subr.bf16.mxu1 %v3505_v32 }
 0x9a5   : > { %v1604_v28 = vsel %vm679_vm2, %v1603_v27, 0.0  ;;  %v3043_v27 = vld [vmem:[%s4503_s8 + $0x1] ss:$0 sm:$0xff] }
 0x9a6   : > { %1605 = vadd.xlane.f32.xlu1 %v1604_v28 }
 0x9a7   : > { %1675 = vmatpush1.bf16.msra.mxu1 %v3503_v34 }
 0x9a8   : > { %1676 = vmatprep.subr.bf16.mxu1 %v3508_v37 }
 0x9ab   : > { %1677 = vmatpush1.bf16.msra.mxu1 %v3506_v35 }
 0x9ac   : > { %1895 = vmatprep.subr.bf16.mxu1 %v3519_v15 }
 0xa33   : > { %v1606_v38 = vpop.xlane.xlu1 %1605 }
 0xa34   : > { %v1607_v39 = vmul.f32 0.015625, %v1606_v38 }
 0xa36   : > { %v1608_v40 = vadd.f32 1e-06, %v1607_v39  ;;  %v3529_v39 = vld [vmem:[%s4506_s11 + $0x10] sm:$0xff]  }
 0xa38   : > { %3577 = vrsqrt.f32 %v1608_v40  ;;  %v3530_v40 = vld [vmem:[%s4506_s11 + $0x18] sm:$0xff]  }
 0xa42   : > { %v3578_v41 = vpop.eup %3577 }
 0xa43   : > { %v1610_v20 = vmul.f32 %v3578_v41, %v4107_v23 }
 0xa45   : > { %v1617_v44 = vmul.f32 %v3023_v42, %v1610_v20 }
 0xa47   : > { %v1626_v45 = vpack.c.bf16 %v1617_v44, %v1617_v44 }
 0xa49   : > { %3032 = vmatmul.mubr.msk.bf16.vlgmr.msra.gmra.mrb[28].mxu1 %vm679_vm2, %v1626_v45 }
 0xa4a   : > { %1927 = vmatprep.mubr.bf16.mxu1 %v3673_v0  ;;  %1896 = vmatpush1.bf16.msra.mxu1 %v3517_v16 }
 0xa4b   : > { %1897 = vmatprep.subr.bf16.mxu1 %v3522_v63 }
 0xa4e   : > { %1898 = vmatpush1.bf16.msra.mxu1 %v3520_v17 }
 0xa4f   : > { %1899 = vmatprep.subr.bf16.mxu1 %v3525_v18 }
 0xa52   : > { %1900 = vmatpush1.bf16.msra.mxu1 %v3523_v19 }
 0xa53   : > { %1901 = vmatprep.subr.bf16.mxu1 %v3528_v22 }
 0xa56   : > { %1902 = vmatpush1.bf16.msra.mxu1 %v3526_v21 }
 0xa57   : > { %3313 = vmatprep.subr.bf16.mxu1 %v3675_v7 }
 0xb1c   : > { %v1704_v55 = vpop.f32.mrb[28].mxu1 }
 0xb1d   : > { %v3033_v56 = vmul.f32 -1.442695, %v1704_v55  ;;  %v1706_v57 = vpop.f32.mrb[29].mxu1 }
 0xb1e   : > { %v1708_v58 = vpop.f32.mrb[30].mxu1 }
 0xb1f   : > { %3579 = vpow2.f32 %v3033_v56  ;;  %v1709_v59 = vpop.f32.mrb[31].mxu1 }
 0xb29   : > { %v3580_v60 = vpop.eup %3579 }
 0xb2a   : > { %v1714_v61 = vadd.f32 1.0, %v3580_v60 }
 0xb2c   : > { %3581 = vrcp.f32 %v1714_v61 }
 0xb36   : > { %v3582_v62 = vpop.eup %3581 }
 0xb37   : > { %v1717_v1 = vmul.f32 %v3582_v62, %v1704_v55 }
 0xb39   : > { %v1718_v2 = vmul.f32 %v1717_v1, %v1706_v57 }
 0xb3b   : > { %v1735_v3 = vpack.c.bf16 %v1718_v2, %v1718_v2 }
 0xb3d   : > { %3310 = vmatmul.mubr.bf16.vlgmr.msra.gmra.mrb[24].mxu0 %v1735_v3 }
 0xb3e   : > { %3327 = vmatprep.mubr.msk.bf16.mxu0 %vm3676_vm5, %v3675_v7  ;;  %3324 = vmatpush3.bf16.msra.mxu0 %v3529_v39 }
 0xb3f   : > { %3325 = vmatprep.subr.bf16.mxu0 %v3675_v7 }
 0xb42   : > { %3326 = vmatpush3.bf16.msra.mxu0 %v3530_v40 }
 0xb43   : > { %3337 = vmatprep.subr.bf16.mxu0 %v3675_v7 }
 0xc10   : > { %v1818_v4 = vpop.f32.mrb[24].mxu0 }
 0xc11   : > { %v4177_v5 = vadd.f32 %v1818_v4, %v4107_v23  ;;  %v3311_v9 = vpop.f32.mrb[25].mxu0 }
 0xc12   : > { %v1821_v11 = vpop.f32.mrb[26].mxu0 }
 0xc13   : > { %v3312_v12 = vpop.f32.mrb[27].mxu0  ;;  %v1827_v13 = vmul.f32 %v4177_v5, %v4177_v5 }
 0xc15   : > { %v1828_v14 = vsel %vm679_vm2, %v1827_v13, 0.0 }
 0xc16   : > { %1829 = vadd.xlane.f32.xlu0 %v1828_v14 }
 0xca3   : > { %v1830_v23 = vpop.xlane.xlu0 %1829 }
 0xca4   : > { %v1831_v24 = vmul.f32 0.015625, %v1830_v23 }
 0xca6   : > { %v1832_v25 = vadd.f32 1e-06, %v1831_v24 }
 0xca8   : > { %3583 = vrsqrt.f32 %v1832_v25 }
 0xcb2   : > { %v3584_v26 = vpop.eup %3583 }
 0xcb3   : > { %v1834_v28 = vmul.f32 %v3584_v26, %v4177_v5 }
 0xcb5   : > { %v1841_v29 = vmul.f32 %v3043_v27, %v1834_v28 }
 0xcb7   : > { %v1851_v30 = vpack.c.bf16 %v1841_v29, %v1841_v29 }
 0xcb9   : > { %3060 = vmatmul.mubr.msk.bf16.vlgmr.msra.gmra.mrb[32].mxu1 %vm679_vm2, %v1851_v30 }
 0xcba   : > { %3314 = vmatpush3.bf16.msra.mxu1 %v3924_v6  ;;  %3319 = vmatprep.mubr.msk.bf16.mxu1 %vm3676_vm5, %v3675_v7 }
 0xcbb   : > { %3315 = vmatprep.subr.bf16.mxu1 %v3675_v7 }
 0xcbe   : > { %3316 = vmatpush3.bf16.msra.mxu1 %v3932_v8 }
 0xcbf   : > { %3317 = vmatprep.subr.bf16.mxu1 %v3675_v7 }
 0xcc2   : > { %3318 = vmatpush3.bf16.msra.mxu1 %v3941_v10  ;;  %v3062_v10 = vld [vmem:[%s4505_s10 + $0x1] ss:$0 sm:$0xff] }
 0xcc3   : > { %3331 = vmatprep.subr.bf16.mxu1 %v3675_v7 }
 0xd8c   : > { %v4220_v50 = vpop.f32.mrb[32].mxu1 }
 0xd8d   : > { %v1931_v31 = vpop.f32.mrb[33].mxu1  ;;  %v1961_v32 = vpack.c.bf16 %v4220_v50, %v4220_v50  ;;  %v1938_v6 = vmul.f32 %v4220_v50, %v4220_v50  ;;  %v1959_v62 = vmul.f32 %v4220_v50, %v3991_v43 }
 0xd8e   : > { %v1933_v34 = vpop.f32.mrb[34].mxu1  ;;  %v1962_v38 = vpack.c.bf16 %v1931_v31, %v1931_v31  ;;  %v1960_v59 = vmul.f32 %v1931_v31, %v3991_v43 }
 0xd8f   : > { %1965 = vrot.lane.b32.xlu1 %v1961_v32, %s4540_s29  ;;  %1940 = vrot.lane.b32.xlu0 %v1938_v6, %s4541_s20  ;;  %v1934_v8 = vpop.f32.mrb[35].mxu1 }
 0xd93   : > { %1955 = vrot.lane.b32.xlu0 %v3062_v10, %s4541_s20 }
 0xe01   : > { %v1941_v35 = vpop.permute.xlu0 %1940  ;;  %v1966_v41 = vpop.permute.xlu1 %1965 }
 0xe02   : > { %v1943_v37 = vsel %vm847_vm6, %v1941_v35, 0.0 }
 0xe03   : > { %1944 = vadd.xlane.f32.xlu1 %v1943_v37 }
 0xe05   : > { %v1956_v48 = vpop.permute.xlu0 %1955 }
 0xe14   : > { %1967 = vrot.lane.b32.xlu1 %v1962_v38, %s4540_s29 }
 0xe90   : > { %v1945_v42 = vpop.xlane.xlu1 %1944 }
 0xe91   : > { %v1946_v20 = vmul.f32 0.03125, %v1945_v42 }
 0xe93   : > { %v1947_v44 = vadd.f32 1e-06, %v1946_v20 }
 0xe94   : > { %v1968_v45 = vpop.permute.xlu1 %1967 }
 0xe95   : > { %3585 = vrsqrt.f32 %v1947_v44  ;;  %v1969_v46 = vsel %vm847_vm6, %v1966_v41, %v1968_v45 }
 0xe96   : > { %3320 = vmatmul.mubr.msk.bf16.vlgmr.msra.gmra.mrb[36].mxu1 %vm896_vm7, %v1969_v46 }
 0xe97   : > { %3333 = vmatprep.mubr.msk.bf16.mxu1 %vm3676_vm5, %v3675_v7 }
 0xe9f   : > { %v3586_v47 = vpop.eup %3585 }
 0xea0   : > { %v1949_v49 = vmul.f32 %v3586_v47, %v4220_v50 }
 0xea2   : > { %v1958_v51 = vmul.f32 %v1956_v48, %v1949_v49 }
 0xea4   : > { %v2025_v52 = vpack.c.bf16 %v1958_v51, %v1958_v51 }
 0xea6   : > { %2027 = vrot.lane.b32.xlu1 %v2025_v52, %s4541_s20 }
 0xf18   : > { %v2028_v53 = vpop.permute.xlu1 %2027 }
 0xf19   : > { %3328 = vmatmul.mubr.msk.bf16.vlgmr.msra.gmra.mrb[28].mxu0 %vm847_vm6, %v2028_v53 }
 0xf1a   : > { %3339 = vmatprep.mubr.msk.bf16.mxu0 %vm3676_vm5, %v3675_v7 }
 0xf69   : > { %v2007_v54 = vpop.f32.mrb[36].mxu1 }
 0xf6a   : > { %v2013_v55 = vmul.f32 %v2007_v54, %v3984_v36  ;;  %v3321_v56 = vpop.f32.mrb[37].mxu1 }
 0xf6b   : > { %v2010_v57 = vpop.f32.mrb[38].mxu1 }
 0xf6c   : > { %2015 = vrot.lane.b32.xlu0 %v2013_v55, %s4542_s30  ;;  %v3322_v58 = vpop.f32.mrb[39].mxu1 }
 0xfde   : > { %v2016_v60 = vpop.permute.xlu0 %2015 }
 0xfdf   : > { %v2019_v61 = vadd.f32 %v2016_v60, %v1960_v59  ;;  %v2018_v1 = vadd.f32 %v2016_v60, %v1959_v62 }
 0xfe1   : > { %2112 = vrot.lane.b32.xlu1 %v2019_v61, %s4543_s28 }
 0xfe5   : > { %2090 = vrot.lane.b32.xlu1 %v4220_v50, %s4544_s26 }
 0xfe9   : > { %2085 = vrot.lane.b32.xlu1 %v2018_v1, %s4545_s23 }
 0xfec   : > { %v4260_v36 = vpop.f32.mrb[28].mxu0 }
 0xfed   : > { %v3329_v2 = vpop.f32.mrb[29].mxu0  ;;  %2117 = vrot.lane.b32.xlu0 %v4260_v36, %s4544_s26  ;;  %2125 = vrot.lane.b32.xlu1 %v4260_v36, %s4546_s18 }
 0xfee   : > { %v2081_v3 = vpop.f32.mrb[30].mxu0 }
 0xfef   : > { %v3330_v4 = vpop.f32.mrb[31].mxu0 }
 0xff1   : > { %2121 = vrot.lane.b32.xlu0 %v4260_v36, %s4542_s30  ;;  %2100 = vrot.lane.b32.xlu1 %v2018_v1, %s4540_s29 }
 0xff5   : > { %2093 = vrot.lane.b32.xlu0 %v2018_v1, %s4547_s19  ;;  %2107 = vrot.lane.b32.xlu1 %v2018_v1, %s4548_s27 }
 0xff9   : > { %2097 = vrot.lane.b32.xlu0 %v4220_v50, %s4542_s30  ;;  %s512_s30 = sand.u32 1, %s3663_s22  }
 0xffa   : > { %s2975_s26 = sshll.u32 %s512_s30, 2 }
 0xffb   : > { %s514_s19 = scalar_lea.vmem [#allocation2], %s2975_s26  ;;  %s3613_s26 = sshll.u32 %s3687_s17, 4  ;;  %s3614_s26 = int_to_ptr.vmem [resolvable:$false] %s3613_s26 }
 0xffc   : > { %s2912_s27 = sshll.u32 %s514_s19, 4  ;;  %s4455_s27 = int_to_ptr.vmem [resolvable:$true] %s2912_s27 }
 0xffd   : > { %2104 = vrot.lane.b32.xlu0 %v4220_v50, %s4546_s18  ;;  %s3137_s18 = sshll.u32 %s3794_s25, 6  ;;  %s2899_s25 = scalar_lea.sflag [#allocation3], %s512_s30 }
 0xffe   : > { %p3616_p0 = scmp.lt.s32.totalorder %s4455_s27, %s3614_s26 }
0x1053   : > { %v2113_v43 = vpop.permute.xlu1 %2112 }
0x1054   : > { %v2115_v9 = vsel %vm1017_vm8, %v4260_v36, %v2113_v43 }
0x1055   : > { %v2133_v11 = vpack.c.bf16 %v2115_v9, %v2115_v9 }
0x1057   : > { %v2091_v12 = vpop.permute.xlu1 %2090  ;;  %v2141_v13 = vsel %vm1067_vm9, %v2133_v11, 0 }
0x1058   : > { %3332 = vmatpush3.bf16.xpose.msra.mxu1 %v2141_v13 }
0x1059   : > { %3343 = vmatprep.subr.bf16.mxu1 %v3675_v7 }
0x105b   : > { %v2086_v14 = vpop.permute.xlu1 %2085 }
0x105c   : > { %v2088_v15 = vsel %vm1017_vm8, %v4220_v50, %v2086_v14 }
0x105d   : > { %v2129_v16 = vpack.c.bf16 %v2088_v15, %v2088_v15 }
0x105f   : > { %3334 = vmatmul.mubr.msk.bf16.vlgmr.msra.gmra.mrb[40].mxu1 %vm1067_vm9, %v2129_v16  ;;  %v4282_v63 = vpop.permute.xlu0 %2117  ;;  %v4288_v18 = vpop.permute.xlu1 %2125 }
0x1060   : > { %v2120_v17 = vsel %vm1017_vm8, %v4282_v63, %v2113_v43  ;;  %3345 = vmatprep.mubr.msk.bf16.mxu1 %vm3676_vm5, %v3675_v7  ;;  %v2128_v23 = vsel %vm1017_vm8, %v4288_v18, %v2113_v43  ;;  %v2372_v11 = vpack.c.bf16 %v4288_v18, %v4288_v18 }
0x1061   : > { %v2134_v19 = vpack.c.bf16 %v2120_v17, %v2120_v17  ;;  %v2136_v26 = vpack.c.bf16 %v2128_v23, %v2128_v23 }
0x1063   : > { %v4290_v21 = vpop.permute.xlu0 %2121  ;;  %v2187_v22 = vsel %vm1067_vm9, %v2134_v19, 0  ;;  %v2101_v30 = vpop.permute.xlu1 %2100  ;;  %v2279_v32 = vsel %vm1067_vm9, %v2136_v26, 0 }
0x1064   : > { %v2124_v24 = vsel %vm1017_vm8, %v4290_v21, %v2113_v43  ;;  %3338 = vmatpush3.bf16.xpose.msra.mxu0 %v2187_v22  ;;  %v2370_v43 = vpack.c.bf16 %v4282_v63, %v4282_v63  ;;  %v2371_v9 = vpack.c.bf16 %v4290_v21, %v4290_v21 }
0x1065   : > { %v2135_v25 = vpack.c.bf16 %v2124_v24, %v2124_v24  ;;  %3349 = vmatprep.subr.bf16.mxu0 %v3675_v7 }
0x1067   : > { %v2094_v27 = vpop.permute.xlu0 %2093  ;;  %v2233_v28 = vsel %vm1067_vm9, %v2135_v25, 0  ;;  %v2108_v8 = vpop.permute.xlu1 %2107 }
0x1068   : > { %v2096_v29 = vsel %vm1017_vm8, %v2091_v12, %v2094_v27  ;;  %3344 = vmatpush3.bf16.xpose.msra.mxu1 %v2233_v28 }
0x1069   : > { %v2130_v50 = vpack.c.bf16 %v2096_v29, %v2096_v29  ;;  %3355 = vmatprep.subr.bf16.mxu1 %v3675_v7 }
0x106b   : > { %3340 = vmatmul.mubr.msk.bf16.vlgmr.msra.gmra.mrb[32].mxu0 %vm1067_vm9, %v2130_v50  ;;  %v2098_v31 = vpop.permute.xlu0 %2097 }
0x106c   : > { %v2103_v6 = vsel %vm1017_vm8, %v2098_v31, %v2101_v30  ;;  %3350 = vmatpush3.bf16.xpose.msra.mxu0 %v2279_v32  ;;  %3351 = vmatprep.mubr.msk.bf16.mxu0 %vm3676_vm5, %v3675_v7 }
0x106d   : > { %v2131_v34 = vpack.c.bf16 %v2103_v6, %v2103_v6  ;;  %3361 = vmatprep.subr.bf16.mxu0 %v3675_v7 }
0x106f   : > { %3346 = vmatmul.mubr.msk.bf16.vlgmr.msra.gmra.mrb[44].mxu1 %vm1067_vm9, %v2131_v34  ;;  %v2105_v10 = vpop.permute.xlu0 %2104 }
0x1070   : > { %v2110_v35 = vsel %vm1017_vm8, %v2105_v10, %v2108_v8  ;;  %3357 = vmatprep.mubr.msk.bf16.mxu1 %vm3676_vm5, %v3675_v7 }
0x1071   : > { %v2132_v37 = vpack.c.bf16 %v2110_v35, %v2110_v35 }
0x1073   : > { %3352 = vmatmul.mubr.msk.bf16.vlgmr.msra.gmra.mrb[36].mxu0 %vm1067_vm9, %v2132_v37 }
0x1074   : > { %3363 = vmatprep.mubr.msk.bf16.mxu0 %vm3676_vm5, %v3675_v7 }
0x1132   : > { %v2177_v38 = vpop.f32.mrb[40].mxu1 }
0x1133   : > { %v2321_v39 = vmul.f32 0.20412415, %v2177_v38  ;;  %v3335_v40 = vpop.f32.mrb[41].mxu1 }
0x1134   : > { %v2180_v41 = vpop.f32.mrb[42].mxu1 }
0x1135   : > { %v3336_v42 = vpop.f32.mrb[43].mxu1  ;;  %v2325_v20 = vadd.f32 %v2321_v39, %v4046_v33  ;;  %v3531_v41 = vld [vmem:[%s4507_s12 + $0x20] sm:$0xff]  }
0x1137   : > { %v2329_v44 = vsel %vm1260_vm11, %v2325_v20, -inf }
0x1138   : > { %2330 = vmax.xlane.f32.xlu0 %v2329_v44  ;;  %v3533_v44 = vld [vmem:[%s4507_s12 + $0x30] sm:$0xff]  }
0x113e   : > { %v2223_v45 = vpop.f32.mrb[32].mxu0 }
0x113f   : > { %v2322_v46 = vmul.f32 0.20412415, %v2223_v45  ;;  %v3341_v47 = vpop.f32.mrb[33].mxu0 }
0x1140   : > { %v2226_v48 = vpop.f32.mrb[34].mxu0 }
0x1141   : > { %v3342_v49 = vpop.f32.mrb[35].mxu0  ;;  %v2326_v51 = vadd.f32 %v2322_v46, %v4046_v33 }
0x1142   : > { %v2269_v52 = vpop.f32.mrb[44].mxu1 }
0x1143   : > { %v2323_v53 = vmul.f32 0.20412415, %v2269_v52  ;;  %v3347_v54 = vpop.f32.mrb[45].mxu1  ;;  %v2332_v55 = vsel %vm1260_vm11, %v2326_v51, -inf }
0x1144   : > { %2333 = vmax.xlane.f32.xlu1 %v2332_v55  ;;  %v2272_v56 = vpop.f32.mrb[46].mxu1 }
0x1145   : > { %v3348_v57 = vpop.f32.mrb[47].mxu1  ;;  %v2327_v58 = vadd.f32 %v2323_v53, %v4046_v33 }
0x1146   : > { %v2315_v59 = vpop.f32.mrb[36].mxu0 }
0x1147   : > { %v2324_v60 = vmul.f32 0.20412415, %v2315_v59  ;;  %v3353_v61 = vpop.f32.mrb[37].mxu0  ;;  %v2335_v62 = vsel %vm1260_vm11, %v2327_v58, -inf }
0x1148   : > { %v2318_v1 = vpop.f32.mrb[38].mxu0  ;;  %2336 = vmax.xlane.f32.xlu0 %v2335_v62 }
0x1149   : > { %v3354_v2 = vpop.f32.mrb[39].mxu0  ;;  %v2328_v3 = vadd.f32 %v2324_v60, %v4046_v33  ;;  %v2369_v33 = vpack.c.bf16 %v4260_v36, %v4260_v36 }
0x114b   : > { %v2338_v4 = vsel %vm1260_vm11, %v2328_v3, -inf }
0x114c   : > { %2339 = vmax.xlane.f32.xlu0 %v2338_v4 }
0x1155   : > { %2423 = vrot.lane.b32.xlu1 %v2370_v43, %s4541_s20 }
0x1159   : > { %2472 = vrot.lane.b32.xlu1 %v2371_v9, %s4541_s20 }
0x115d   : > { %2521 = vrot.lane.b32.xlu1 %v2372_v11, %s4541_s20 }
0x1162   : > { %2374 = vrot.lane.b32.xlu0 %v2369_v33, %s4541_s20  ;;  %s3615_s20 = scalar_lea.vmem %s3614_s26, 128 }
0x11c5   : > { %v2331_v12 = vpop.xlane.xlu0 %2330 }
0x11c6   : > { %v2341_v13 = vsub.f32 %v2325_v20, %v2331_v12  ;;  %v3532_v20 = vld [vmem:[%s4507_s12 + $0x28] sm:$0xff]  }
0x11c8   : > { %v2345_v14 = vmul.f32 1.442695, %v2341_v13 }
0x11ca   : > { %3587 = vpow2.f32 %v2345_v14 }
0x11d1   : > { %v2334_v15 = vpop.xlane.xlu1 %2333 }
0x11d2   : > { %v2342_v16 = vsub.f32 %v2326_v51, %v2334_v15  ;;  %v3534_v51 = vld [vmem:[%s4507_s12 + $0x38] sm:$0xff]  }
0x11d4   : > { %v2347_v63 = vmul.f32 1.442695, %v2342_v16  ;;  %v3588_v26 = vpop.eup %3587 }
0x11d5   : > { %v2424_v17 = vpop.permute.xlu1 %2423  ;;  %v2337_v19 = vpop.xlane.xlu0 %2336  ;;  %v2365_v50 = vpack.c.bf16 %v3588_v26, %v3588_v26  ;;  %v2353_v40 = vsel %vm1260_vm11, %v3588_v26, 0.0 }
0x11d6   : > { %3589 = vpow2.f32 %v2347_v63  ;;  %v2429_v21 = vsel %vm538_vm0, %v2424_v17, 0  ;;  %v2343_v18 = vsub.f32 %v2327_v58, %v2337_v19 }
0x11d7   : > { %3362 = vmatpush3.bf16.msra.mxu0 %v2429_v21 }
0x11d8   : > { %v2349_v22 = vmul.f32 1.442695, %v2343_v18  ;;  %3373 = vmatprep.subr.bf16.mxu0 %v3675_v7 }
0x11d9   : > { %v2340_v36 = vpop.xlane.xlu0 %2339  ;;  %v2473_v23 = vpop.permute.xlu1 %2472 }
0x11da   : > { %3591 = vpow2.f32 %v2349_v22  ;;  %v2344_v24 = vsub.f32 %v2328_v3, %v2340_v36  ;;  %v2478_v6 = vsel %vm538_vm0, %v2473_v23, 0 }
0x11dc   : > { %v2351_v25 = vmul.f32 1.442695, %v2344_v24 }
0x11dd   : > { %v2375_v27 = vpop.permute.xlu0 %2374  ;;  %v2522_v30 = vpop.permute.xlu1 %2521 }
0x11de   : > { %3593 = vpow2.f32 %v2351_v25  ;;  %v2380_v28 = vsel %vm538_vm0, %v2375_v27, 0  ;;  %v2527_v34 = vsel %vm538_vm0, %v2522_v30, 0  ;;  %v3537_v27 = vld [vmem:[%s4509_s14 + $0x44] ss:$8 sps:$4 sm:$0xff]  }
0x11df   : > { %3356 = vmatpush3.bf16.msra.mxu1 %v2380_v28  ;;  %v3535_v28 = vld [vmem:[%s4509_s14 + $0x40] ss:$8 sps:$4 sm:$0xff]   ;;  %v3543_v30 = vld [vmem:[%s4509_s14 + $0x64] ss:$8 sps:$4 sm:$0xff]  }
0x11e0   : > { %v3590_v29 = vpop.eup %3589  ;;  %3367 = vmatprep.subr.bf16.mxu1 %v3675_v7 }
0x11e1   : > { %v2356_v31 = vsel %vm1260_vm11, %v3590_v29, 0.0  ;;  %v2366_v32 = vpack.c.bf16 %v3590_v29, %v3590_v29  ;;  %v3538_v29 = vld [vmem:[%s4509_s14 + $0x50] ss:$8 sps:$4 sm:$0xff]  }
0x11e2   : > { %2357 = vadd.xlane.f32.xlu0 %v2356_v31  ;;  %3358 = vmatmul.mubr.msk.bf16.vlgmr.msra.gmra.mrb[48].mxu1 %vm1260_vm11, %v2365_v50  ;;  %v3541_v50 = vld [vmem:[%s4509_s14 + $0x60] ss:$8 sps:$4 sm:$0xff]   ;;  %v3544_v31 = vld [vmem:[%s4509_s14 + $0x70] ss:$8 sps:$4 sm:$0xff]  }
0x11e3   : > { %3364 = vmatmul.mubr.msk.bf16.vlgmr.msra.gmra.mrb[40].mxu0 %vm1260_vm11, %v2366_v32  ;;  %3368 = vmatpush3.bf16.msra.mxu1 %v2478_v6  ;;  %v3546_v32 = vld [vmem:[%s4509_s14 + $0x74] ss:$8 sps:$4 sm:$0xff]  }
0x11e4   : > { %v3592_v8 = vpop.eup %3591  ;;  %3374 = vmatpush3.bf16.msra.mxu0 %v2527_v34  ;;  %3369 = vmatprep.mubr.msk.bf16.mxu1 %vm3676_vm5, %v3675_v7 }
0x11e5   : > { %v2359_v10 = vsel %vm1260_vm11, %v3592_v8, 0.0  ;;  %3375 = vmatprep.mubr.msk.bf16.mxu0 %vm3676_vm5, %v3675_v7  ;;  %3379 = vmatprep.subr.bf16.mxu1 %v3675_v7  ;;  %v2367_v37 = vpack.c.bf16 %v3592_v8, %v3592_v8 }
0x11e6   : > { %2360 = vadd.xlane.f32.xlu1 %v2359_v10  ;;  %2740 = vmatprep.subr.bf16.mxu0 %v3537_v27 }
0x11e8   : > { %v3594_v35 = vpop.eup %3593 }
0x11e9   : > { %v2362_v38 = vsel %vm1260_vm11, %v3594_v35, 0.0  ;;  %v2368_v39 = vpack.c.bf16 %v3594_v35, %v3594_v35  ;;  %v3093_v35 = vld [vmem:[%s4508_s13 + $0x1] ss:$0 sm:$0xff] }
0x11ea   : > { %2363 = vadd.xlane.f32.xlu0 %v2362_v38  ;;  %3370 = vmatmul.mubr.msk.bf16.vlgmr.msra.gmra.mrb[52].mxu1 %vm1260_vm11, %v2367_v37 }
0x11eb   : > { %3376 = vmatmul.mubr.msk.bf16.vlgmr.msra.gmra.mrb[44].mxu0 %vm1260_vm11, %v2368_v39  ;;  %3387 = vmatprep.mubr.msk.bf16.mxu1 %vm3676_vm5, %v3675_v7 }
0x11ec   : > { %2772 = vmatprep.mubr.bf16.mxu0 %v3673_v0  ;;  %3380 = vmatpush3.bf16.msra.mxu1 %v3531_v41  ;;  %v3548_v41 = vld [vmem:[%s4510_s15 + $0x48] sm:$0xff]  }
0x11ed   : > { %3381 = vmatprep.subr.bf16.mxu1 %v3675_v7  ;;  %2741 = vmatpush1.bf16.msra.mxu0 %v3535_v28 }
0x11ee   : > { %2354 = vadd.xlane.f32.xlu0 %v2353_v40  ;;  %v3547_v40 = vld [vmem:[%s4510_s15 + $0x40] sm:$0xff]  }
0x11f0   : > { %3382 = vmatpush3.bf16.msra.mxu1 %v3532_v20  ;;  %v3550_v20 = vld [vmem:[%s4510_s15 + $0x58] sm:$0xff]  }
0x11f1   : > { %3383 = vmatprep.subr.bf16.mxu1 %v3675_v7 }
0x11f4   : > { %3384 = vmatpush3.bf16.msra.mxu1 %v3533_v44  ;;  %v3552_v44 = vld [vmem:[%s4510_s15 + $0x68] sm:$0xff]  }
0x11f5   : > { %3385 = vmatprep.subr.bf16.mxu1 %v3675_v7 }
0x11f8   : > { %3386 = vmatpush3.bf16.msra.mxu1 %v3534_v51 }
0x11f9   : > { %3391 = vmatprep.subr.bf16.mxu1 %v3675_v7 }
0x126f   : > { %v2358_v42 = vpop.xlane.xlu0 %2357 }
0x1270   : > { %3595 = vrcp.f32 %v2358_v42  ;;  %v3549_v42 = vld [vmem:[%s4510_s15 + $0x50] sm:$0xff]  }
0x1273   : > { %v2361_v0 = vpop.xlane.xlu1 %2360 }
0x1274   : > { %3597 = vrcp.f32 %v2361_v0  ;;  %v3551_v0 = vld [vmem:[%s4510_s15 + $0x60] sm:$0xff]  }
0x1277   : > { %v2364_v45 = vpop.xlane.xlu0 %2363 }
0x1278   : > { %3599 = vrcp.f32 %v2364_v45  ;;  %v3553_v45 = vld [vmem:[%s4510_s15 + $0x70] sm:$0xff]  }
0x127a   : > { %v3596_v47 = vpop.eup %3595 }
0x127b   : > { %v2355_v33 = vpop.xlane.xlu0 %2354 }
0x127c   : > { %3601 = vrcp.f32 %v2355_v33 }
0x127e   : > { %v3598_v58 = vpop.eup %3597 }
0x1282   : > { %v3600_v43 = vpop.eup %3599 }
0x1286   : > { %v3602_v12 = vpop.eup %3601 }
0x12b5   : > { %v2416_v46 = vpop.f32.mrb[48].mxu1 }
0x12b6   : > { %v3359_v48 = vpop.f32.mrb[49].mxu1  ;;  %v2465_v49 = vpop.f32.mrb[40].mxu0  ;;  %v2573_v15 = vmul.f32 %v3602_v12, %v2416_v46  ;;  %v3554_v46 = vld [vmem:[%s4510_s15 + $0x78] sm:$0xff]  }
0x12b7   : > { %v2574_v52 = vmul.f32 %v3596_v47, %v2465_v49  ;;  %v2419_v53 = vpop.f32.mrb[50].mxu1  ;;  %v3365_v54 = vpop.f32.mrb[41].mxu0 }
0x12b8   : > { %v3360_v55 = vpop.f32.mrb[51].mxu1  ;;  %v2468_v56 = vpop.f32.mrb[42].mxu0 }
0x12b9   : > { %v3366_v57 = vpop.f32.mrb[43].mxu0  ;;  %2578 = vrot.lane.b32.xlu0 %v2574_v52, %s4543_s28  ;;  %s4453_s28 = scalar_lea.hbm %s4511_s16, %s3137_s18 }
0x12bd   : > { %v2514_v59 = vpop.f32.mrb[52].mxu1 }
0x12be   : > { %v2575_v60 = vmul.f32 %v3598_v58, %v2514_v59  ;;  %v3371_v61 = vpop.f32.mrb[53].mxu1  ;;  %v2563_v62 = vpop.f32.mrb[44].mxu0 }
0x12bf   : > { %v2517_v1 = vpop.f32.mrb[54].mxu1  ;;  %v3377_v2 = vpop.f32.mrb[45].mxu0  ;;  %v2576_v11 = vmul.f32 %v3600_v43, %v2563_v62 }
0x12c0   : > { %v2566_v3 = vpop.f32.mrb[46].mxu0  ;;  %2582 = vrot.lane.b32.xlu1 %v2575_v60, %s4540_s29  ;;  %v3372_v4 = vpop.f32.mrb[55].mxu1 }
0x12c1   : > { %v3378_v9 = vpop.f32.mrb[47].mxu0 }
0x12c4   : > { %2586 = vrot.lane.b32.xlu1 %v2576_v11, %s4545_s23  ;;  %s3609_s23 = scalar_lea.vmem %s4455_s27, 64 }
0x12c5   : > { %p3610_p11 = scmp.ne.s32.totalorder %s4455_s27, %s3609_s23  ;;  %p3617_p1 = scmp.lt.s32.totalorder %s3615_s20, %s3609_s23 }
0x12c7   : > { %p3611_p12 = pnand %p3610_p11, %p3811_p5  ;;  %p3618_p2 = por %p3617_p1, %p3616_p0 }
0x12c9   : > { %p3612_p13 = pneg %p3611_p12 }
0x12cb   : > { %p3619_p3 = pnand %p3618_p2, %p3612_p13 }
0x132b   : > { %v2579_v13 = vpop.permute.xlu0 %2578 }
0x132c   : > { %v2589_v16 = vsel %vm1017_vm8, %v2573_v15, %v2579_v13 }
0x1332   : > { %v2583_v14 = vpop.permute.xlu1 %2582 }
0x1333   : > { %v2590_v63 = vsel %vm847_vm6, %v2589_v16, %v2583_v14 }
0x1336   : > { %v2587_v17 = vpop.permute.xlu1 %2586 }
0x1337   : > { %v2591_v19 = vsel %vm1523_vm12, %v2590_v63, %v2587_v17 }
0x1338   : > { %v2601_v21 = vpack.c.bf16 %v2591_v19, %v2591_v19 }
0x133a   : > { %3388 = vmatmul.mubr.msk.bf16.vlgmr.msra.gmra.mrb[56].mxu1 %vm679_vm2, %v2601_v21 }
0x133b   : > { %3407 = vmatprep.mubr.msk.bf16.mxu1 %vm3676_vm5, %v3675_v7  ;;  %3392 = vmatpush3.bf16.msra.mxu1 %v3547_v40 }
0x133c   : > { %3393 = vmatprep.subr.bf16.mxu1 %v3675_v7 }
0x133f   : > { %3394 = vmatpush3.bf16.msra.mxu1 %v3548_v41 }
0x1340   : > { %3395 = vmatprep.subr.bf16.mxu1 %v3675_v7 }
0x1343   : > { %3396 = vmatpush3.bf16.msra.mxu1 %v3549_v42 }
0x1344   : > { %3397 = vmatprep.subr.bf16.mxu1 %v3675_v7 }
0x1347   : > { %3398 = vmatpush3.bf16.msra.mxu1 %v3550_v20 }
0x1348   : > { %3399 = vmatprep.subr.bf16.mxu1 %v3675_v7 }
0x134b   : > { %3400 = vmatpush3.bf16.msra.mxu1 %v3551_v0 }
0x134c   : > { %3401 = vmatprep.subr.bf16.mxu1 %v3675_v7 }
0x134f   : > { %3402 = vmatpush3.bf16.msra.mxu1 %v3552_v44 }
0x1350   : > { %3403 = vmatprep.subr.bf16.mxu1 %v3675_v7 }
0x1353   : > { %3404 = vmatpush3.bf16.msra.mxu1 %v3553_v45 }
0x1354   : > { %3405 = vmatprep.subr.bf16.mxu1 %v3675_v7 }
0x1357   : > { %3406 = vmatpush3.bf16.msra.mxu1 %v3554_v46 }
0x140d   : > { %v2663_v18 = vpop.f32.mrb[56].mxu1 }
0x140e   : > { %v4382_v22 = vadd.f32 %v2663_v18, %v4177_v5  ;;  %v3389_v36 = vpop.f32.mrb[57].mxu1  ;;  %v3540_v5 = vld [vmem:[%s4509_s14 + $0x54] ss:$8 sps:$4 sm:$0xff]  }
0x140f   : > { %v2666_v23 = vpop.f32.mrb[58].mxu1  ;;  %2742 = vmatprep.subr.bf16.mxu0 %v3540_v5 }
0x1410   : > { %v3390_v24 = vpop.f32.mrb[59].mxu1  ;;  %v2672_v25 = vmul.f32 %v4382_v22, %v4382_v22  ;;  %2743 = vmatpush1.bf16.msra.mxu0 %v3538_v29 }
0x1411   : > { %2744 = vmatprep.subr.bf16.mxu0 %v3543_v30 }
0x1412   : > { %v2673_v26 = vsel %vm679_vm2, %v2672_v25, 0.0 }
0x1413   : > { %2674 = vadd.xlane.f32.xlu1 %v2673_v26 }
0x1414   : > { %2745 = vmatpush1.bf16.msra.mxu0 %v3541_v50 }
0x1415   : > { %2746 = vmatprep.subr.bf16.mxu0 %v3546_v32 }
0x1418   : > { %2747 = vmatpush1.bf16.msra.mxu0 %v3544_v31 }
0x14a0   : > { %v2675_v6 = vpop.xlane.xlu1 %2674 }
0x14a1   : > { %v2676_v34 = vmul.f32 0.015625, %v2675_v6 }
0x14a3   : > { %v2677_v8 = vadd.f32 1e-06, %v2676_v34 }
0x14a5   : > { %3603 = vrsqrt.f32 %v2677_v8 }
0x14af   : > { %v3604_v10 = vpop.eup %3603 }
0x14b0   : > { %v2679_v37 = vmul.f32 %v3604_v10, %v4382_v22 }
0x14b2   : > { %v2686_v38 = vmul.f32 %v3093_v35, %v2679_v37 }
0x14b4   : > { %v2696_v39 = vpack.c.bf16 %v2686_v38, %v2686_v38 }
0x14b6   : > { %3110 = vmatmul.mubr.msk.bf16.vlgmr.msra.gmra.mrb[48].mxu0 %vm679_vm2, %v2696_v39 }
0x1589   : > { %v2774_v47 = vpop.f32.mrb[48].mxu0 }
0x158a   : > { %v3111_v48 = vmul.f32 -1.442695, %v2774_v47  ;;  %v2776_v49 = vpop.f32.mrb[49].mxu0 }
0x158b   : > { %v2778_v51 = vpop.f32.mrb[50].mxu0 }
0x158c   : > { %3605 = vpow2.f32 %v3111_v48  ;;  %v2779_v52 = vpop.f32.mrb[51].mxu0 }
0x1596   : > { %v3606_v53 = vpop.eup %3605 }
0x1597   : > { %v2784_v54 = vadd.f32 1.0, %v3606_v53 }
0x1599   : > { %3607 = vrcp.f32 %v2784_v54 }
0x15a3   : > { %v3608_v55 = vpop.eup %3607 }
0x15a4   : > { %v2787_v56 = vmul.f32 %v3608_v55, %v2774_v47 }
0x15a6   : > { %v2788_v57 = vmul.f32 %v2787_v56, %v2776_v49 }
0x15a8   : > { %v2806_v7 = vpack.c.bf16 %v2788_v57, %v2788_v57 }
0x15aa   : > { %3408 = vmatmul.mubr.bf16.vlgmr.msra.gmra.mrb[60].mxu1 %v2806_v7 }
0x167d   : > { %v2889_v58 = vpop.f32.mrb[60].mxu1 }
0x167e   : > { %v2895_v59 = vadd.f32 %v2889_v58, %v4382_v22  ;;  %v3409_v60 = vpop.f32.mrb[61].mxu1 }
0x167f   : > { %v2892_v61 = vpop.f32.mrb[62].mxu1 }
0x1680   : > { %v3410_v62 = vpop.f32.mrb[63].mxu1  ;;  %2897 = vst.msk [vmem:[%s514_s19 - $0x1] sm:$0x1e] %vm2896_vm13, %v2895_v59 }
0x1681   : > { %3622 = shalt.err (!%p3619_p3)
}
0x1682   : > { %s3623_s30 = scalar_lea.hbm %s4453_s28, 64  ;;  %s3627_s29 = scalar_lea.hbm %s4511_s16, 128 }
0x1683   : > { %p3624_p4 = scmp.ne.s32.totalorder %s4453_s28, %s3623_s30  ;;  %p3628_p9 = scmp.lt.u32.totalorder %s4453_s28, %s4511_s16 }
0x1684   : > { %p3629_p10 = scmp.lt.u32.totalorder %s3627_s29, %s3623_s30  ;;  %p3631_p12 = scmp.lt.u32.totalorder %s3623_s30, %s4453_s28 }
0x1685   : > { %p3625_p7 = pnand %p3624_p4, %p3811_p5 }
0x1686   : > { %p3630_p11 = por %p3629_p10, %p3628_p9 }
0x1687   : > { %p3626_p8 = pneg %p3625_p7 }
0x1688   : > { %p3632_p13 = por %p3631_p12, %p3630_p11 }
0x168a   : > { %p3633_p0 = pnand %p3632_p13, %p3626_p8 }
0x168c   : > { %3636 = shalt.err (!%p3633_p0)
}
0x168d   : > { %3411 = dma.vmem_to_hbm [thread:$0]  (%p3811_p5), %s4455_s27, 64, %s4453_s28, %s2899_s25  }
0x168e PF: > { %p3417_p1 = scmp.ge.s32.totalorder %s3671_s24, 2  ;;  %s2924_s20 = sand.u32 1, %s3659_s21  }
0x168f   : > { %s2925_s18 = scalar_lea.sflag [#allocation3], %s2924_s20 }
0x1690   : > { %p3414_p2 = pnand %p3417_p1, %p3815_p6 }
0x1692   : > { %3654 = dma.done.wait (!%p3414_p2), %s2925_s18, 64  }
0x1693   : > { %3656 = vsyncadd (!%p3414_p2), %s2925_s18, 4294967232  ;;  %s4550_s24 = sld [smem:[#allocation6_spill]]  ;;  %s4551_s30 = sld [smem:[#allocation5_spill]] }
0x1694   : > { %s4552_s23 = sld [smem:[#allocation7_spill]]  ;;  %s4553_s21 = smov %s3663_s22 }
0x1699   : > { %p26_p3 = scmp.ge.s32.totalorder %s4550_s24, 4   ;;  %s4554_s22 = smov %s4551_s30 }
0x169b   :  { %28 = sbr.rel (!%p26_p3) target bundleno = 5 (0x5), region = 127 }
0x16a2   :  { %2930 = vsyncpa [#allocation3], 1 }
0x16a3   :  { %2932 = vsyncpa [#allocation3 + $0x1], 1 }

</bundles_post_ra>
